<compile_context>
chip_gen: v7x
topology: tpu7x:2x2x1
jax: 0.10.0
libtpu: 0.0.40
codegen_flags: <defaults>
</compile_context>

<pallas_src>
import functools
import math

import jax
import jax.numpy as jnp
from jax.experimental import pallas as pl
from jax.experimental.pallas import tpu as pltpu

LN_EPS = 1e-5  # torch.nn.LayerNorm default


def _layernorm(v, gamma, beta):
    mu = jnp.mean(v, axis=-1, keepdims=True)
    var = jnp.mean((v - mu) ** 2, axis=-1, keepdims=True)
    return (v - mu) * jax.lax.rsqrt(var + LN_EPS) * gamma + beta


def _gelu_exact(v):
    # torch.nn.functional.gelu default = exact (erf-based) GELU
    # TODO(synk): swap to tanh-approx GELU (EUP) if profiling shows VALU-bound.
    return 0.5 * v * (1.0 + jax.lax.erf(v * (1.0 / math.sqrt(2.0))))


def encoder_layer_kernel(
    tok_ref,                      # (1, S_pad, C) f32  [register ; image] tokens, one batch
    wqkv_ref, bqkv_ref,           # (C, 3C) bf16, (1, 3C) f32  fused q|k|v projection
    wo_ref, bo_ref,               # (C, C) bf16, (1, C) f32
    g1_ref, be1_ref,              # LayerNorm1 gamma/beta (1, C) f32
    g2_ref, be2_ref,              # LayerNorm2 gamma/beta (1, C) f32
    w1_ref, bb1_ref,              # (C, F) bf16, (1, F) f32
    w2_ref, bb2_ref,              # (F, C) bf16, (1, C) f32
    out_ref,                      # (1, S_pad, C) f32
    *, n_head: int, head_dim: int, s_valid: int,
):
    NH, D = n_head, head_dim
    S_pad = tok_ref.shape[1]
    C = NH * D

    x = tok_ref[0]                                          # (S_pad, C) f32

    # ---- LayerNorm 1 + fused QKV (bf16 operands, f32 accumulation) ----
    xn = _layernorm(x, g1_ref[...], be1_ref[...])
    qkv = jnp.dot(xn.astype(jnp.bfloat16), wqkv_ref[...],
                  preferred_element_type=jnp.float32) + bqkv_ref[...]   # (S_pad, 3C)

    # ---- head split via reshape/transpose (no per-head slicing / stacking) ----
    def heads(col0):
        return (qkv[:, col0:col0 + C]
                .reshape(S_pad, NH, D)
                .transpose(1, 0, 2)                         # (NH, S_pad, D)
                .astype(jnp.bfloat16))

    qh, kh, vh = heads(0), heads(C), heads(2 * C)

    scale = 1.0 / math.sqrt(D)
    s = jnp.einsum("hqd,hkd->hqk", qh, kh,
                   preferred_element_type=jnp.float32) * scale          # (NH, S_pad, S_pad)
    if s_valid < S_pad:
        key_idx = jax.lax.broadcasted_iota(jnp.int32, (1, 1, S_pad), 2)
        s = jnp.where(key_idx < s_valid, s, -1e30)          # mask padded keys
    s = s - jnp.max(s, axis=-1, keepdims=True)
    p = jnp.exp(s)
    denom = jnp.sum(p, axis=-1, keepdims=True)
    p = p * pl.reciprocal(denom, approx=False)              # divide on the EUP slot

    o = jnp.einsum("hqk,hkd->hqd", p.astype(jnp.bfloat16), vh,
                   preferred_element_type=jnp.float32)                  # (NH, S_pad, D)

    attn = o.transpose(1, 0, 2).reshape(S_pad, C)           # merge heads

    # ---- output projection + residual ----
    proj = jnp.dot(attn.astype(jnp.bfloat16), wo_ref[...],
                   preferred_element_type=jnp.float32) + bo_ref[...]
    x1 = x + proj

    # ---- LayerNorm 2 + feed-forward + residual ----
    xn2 = _layernorm(x1, g2_ref[...], be2_ref[...])
    # TODO(synk): for realistic C/F add a trailing "arbitrary" F-reduction grid axis
    # streaming (C, tf)/(tf, C) weight slices with a pl.when-initialized accumulator.
    h1 = _gelu_exact(jnp.dot(xn2.astype(jnp.bfloat16), w1_ref[...],
                             preferred_element_type=jnp.float32) + bb1_ref[...])
    h2 = jnp.dot(h1.astype(jnp.bfloat16), w2_ref[...],
                 preferred_element_type=jnp.float32) + bb2_ref[...]

    out_ref[0] = x1 + h2


def encoder_layer_pallas(x_nchw, register, params, *, n_head):
    """x_nchw: (B, C, H, W) float32, register: (B, R, C) float32."""
    B, C, H, W = x_nchw.shape
    _, R, _ = register.shape
    HW = H * W
    S = R + HW
    S_pad = ((S + 7) // 8) * 8           # sublane alignment; padded keys are masked
    D = C // n_head
    F_dim = params["w1"].shape[1]

    # Layout plumbing stays in XLA: channel-major -> token-major, lane dim = C.
    x_tok = jnp.transpose(x_nchw.reshape(B, C, HW), (0, 2, 1))          # (B, HW, C)
    tokens = jnp.concatenate([register, x_tok], axis=1)                 # (B, S, C)
    if S_pad != S:
        tokens = jnp.pad(tokens, ((0, 0), (0, S_pad - S), (0, 0)))

    # Fuse q/k/v once; matmul weights in bf16 (MXU native), biases/LN params f32.
    wqkv = jnp.concatenate([params["wq"], params["wk"], params["wv"]],
                           axis=1).astype(jnp.bfloat16)                 # (C, 3C)
    bqkv = jnp.concatenate([params["bq"], params["bk"], params["bv"]], axis=1)
    wo = params["wo"].astype(jnp.bfloat16)
    w1 = params["w1"].astype(jnp.bfloat16)
    w2 = params["w2"].astype(jnp.bfloat16)

    def rep(shape):
        # Same (weight) block for every grid step; block index never changes.
        # TODO(synk): pipeline_mode=pl.Buffered(1) here at realistic C/F to avoid
        # double-buffering resident weights (halves weight VMEM on v7x).
        zeros = (0,) * len(shape)
        return pl.BlockSpec(shape, lambda b, _z=zeros: _z)

    in_specs = [
        pl.BlockSpec((1, S_pad, C), lambda b: (b, 0, 0)),   # per-batch token tile
        rep((C, 3 * C)), rep((1, 3 * C)),                   # fused qkv
        rep((C, C)), rep((1, C)),                           # o_proj
        rep((1, C)), rep((1, C)),                           # ln1
        rep((1, C)), rep((1, C)),                           # ln2
        rep((C, F_dim)), rep((1, F_dim)),                   # ff1
        rep((F_dim, C)), rep((1, C)),                       # ff2
    ]
    out_specs = pl.BlockSpec((1, S_pad, C), lambda b: (b, 0, 0))

    kernel = functools.partial(
        encoder_layer_kernel, n_head=n_head, head_dim=D, s_valid=S)

    out_tokens = pl.pallas_call(
        kernel,
        out_shape=jax.ShapeDtypeStruct((B, S_pad, C), jnp.float32),
        grid_spec=pltpu.PrefetchScalarGridSpec(
            num_scalar_prefetch=0,
            grid=(B,),                                      # split across TCs on v7x
            in_specs=in_specs,
            out_specs=out_specs,
        ),
        compiler_params=pltpu.CompilerParams(
            dimension_semantics=("parallel",),
            vmem_limit_bytes=64 * 1024 * 1024,
        ),
    )(tokens, wqkv, bqkv,
      wo, params["bo"],
      params["g1"], params["be1"],
      params["g2"], params["be2"],
      w1, params["bb1"],
      w2, params["bb2"])

    reg_out = out_tokens[:, :R, :]
    x_out = out_tokens[:, R:S, :].transpose(0, 2, 1).reshape(B, C, H, W)
    return x_out, reg_out


def reference_jax(x_nchw, register, params, *, n_head):
    """Pure-JAX f32 reference mirroring the PyTorch forward (eval mode)."""
    B, C, H, W = x_nchw.shape
    _, R, _ = register.shape
    head_dim = C // n_head
    x_flat = x_nchw.reshape(B, C, H * W).transpose(0, 2, 1)
    xc = jnp.concatenate([register, x_flat], axis=1)                    # (B, S, C)
    residual = xc
    xn = _layernorm(xc, params["g1"][0], params["be1"][0])
    q = xn @ params["wq"] + params["bq"][0]
    k = xn @ params["wk"] + params["bk"][0]
    v = xn @ params["wv"] + params["bv"][0]
    S = xc.shape[1]
    qh = q.reshape(B, S, n_head, head_dim).transpose(0, 2, 1, 3)
    kh = k.reshape(B, S, n_head, head_dim).transpose(0, 2, 1, 3)
    vh = v.reshape(B, S, n_head, head_dim).transpose(0, 2, 1, 3)
    s = jnp.einsum("bhqd,bhkd->bhqk", qh, kh) / math.sqrt(head_dim)
    p = jax.nn.softmax(s, axis=-1)
    a = jnp.einsum("bhqk,bhkd->bhqd", p, vh).transpose(0, 2, 1, 3).reshape(B, S, C)
    a = a @ params["wo"] + params["bo"][0]
    x1 = residual + a
    xn2 = _layernorm(x1, params["g2"][0], params["be2"][0])
    h1 = _gelu_exact(xn2 @ params["w1"] + params["bb1"][0])
    h2 = h1 @ params["w2"] + params["bb2"][0]
    out = x1 + h2
    reg_out = out[:, :R, :]
    x_out = out[:, R:, :].transpose(0, 2, 1).reshape(B, C, H, W)
    return x_out, reg_out


def make_params(key, embedding_dim, mult):
    C = embedding_dim
    F_dim = mult * C
    ks = jax.random.split(key, 8)
    std = 0.02
    return {
        "wq": jax.random.normal(ks[0], (C, C), jnp.float32) * std,
        "wk": jax.random.normal(ks[1], (C, C), jnp.float32) * std,
        "wv": jax.random.normal(ks[2], (C, C), jnp.float32) * std,
        "wo": jax.random.normal(ks[3], (C, C), jnp.float32) * std,
        "w1": jax.random.normal(ks[4], (C, F_dim), jnp.float32) * std,
        "w2": jax.random.normal(ks[5], (F_dim, C), jnp.float32) * std,
        "bq": jax.random.normal(ks[6], (1, C), jnp.float32) * std,
        "bk": jnp.zeros((1, C), jnp.float32),
        "bv": jax.random.normal(ks[7], (1, C), jnp.float32) * std,
        "bo": jnp.zeros((1, C), jnp.float32),
        "bb1": jnp.zeros((1, F_dim), jnp.float32),
        "bb2": jnp.zeros((1, C), jnp.float32),
        "g1": jnp.ones((1, C), jnp.float32),
        "be1": jnp.zeros((1, C), jnp.float32),
        "g2": jnp.ones((1, C), jnp.float32),
        "be2": jnp.zeros((1, C), jnp.float32),
    }


if __name__ == "__main__":
    # Small shapes consistent with the module: embedding_dim=32, n_head=4,
    # B=2, image 4x4 -> 16 tokens, R=8 register tokens -> S=24.
    B, C, H, W = 2, 32, 4, 4
    R = 8
    n_head = 4
    mult = 2

    key = jax.random.PRNGKey(0)
    kx, kr, kp = jax.random.split(key, 3)
    x = jax.random.normal(kx, (B, C, H, W), jnp.float32)
    register = jax.random.normal(kr, (B, R, C), jnp.float32)
    params = make_params(kp, C, mult)

    x_out, reg_out = encoder_layer_pallas(x, register, params, n_head=n_head)
    x_out = jax.block_until_ready(x_out)
    reg_out = jax.block_until_ready(reg_out)

    # sanity check against pure-JAX f32 reference (kernel matmuls use bf16 operands,
    # f32 accumulation -> tolerance relaxed accordingly).
    x_ref, reg_ref = reference_jax(x, register, params, n_head=n_head)
    assert x_out.shape == (B, C, H, W) and reg_out.shape == (B, R, C)
    assert jnp.allclose(x_out, x_ref, atol=2e-2, rtol=2e-2)
    assert jnp.allclose(reg_out, reg_ref, atol=2e-2, rtol=2e-2)

    print("KERNEL_OK")
</pallas_src>

<mosaic_0001>
module attributes {stable_mosaic.version = 11 : i64} {
  func.func @encoder_layer_kernel(%arg0: i32, %arg1: memref<1x24x32xf32, #tpu.memory_space<vmem>>, %arg2: memref<32x96xbf16, #tpu.memory_space<vmem>>, %arg3: memref<1x96xf32, #tpu.memory_space<vmem>>, %arg4: memref<32x32xbf16, #tpu.memory_space<vmem>>, %arg5: memref<1x32xf32, #tpu.memory_space<vmem>>, %arg6: memref<1x32xf32, #tpu.memory_space<vmem>>, %arg7: memref<1x32xf32, #tpu.memory_space<vmem>>, %arg8: memref<1x32xf32, #tpu.memory_space<vmem>>, %arg9: memref<1x32xf32, #tpu.memory_space<vmem>>, %arg10: memref<32x64xbf16, #tpu.memory_space<vmem>>, %arg11: memref<1x64xf32, #tpu.memory_space<vmem>>, %arg12: memref<64x32xbf16, #tpu.memory_space<vmem>>, %arg13: memref<1x32xf32, #tpu.memory_space<vmem>>, %arg14: memref<1x24x32xf32, #tpu.memory_space<vmem>>) attributes {dimension_semantics = [#tpu.dimension_semantics<parallel>], iteration_bounds = array<i64: 2>, scalar_prefetch = 0 : i64, scratch_operands = 0 : i64, tpu.core_type = #tpu.core_type<tc>, window_params = [{transform_indices = @transform_0, window_bounds = array<i64: 1, 24, 32>}, {pipeline_mode = #tpu.pipeline_mode<synchronous>, transform_indices = @transform_1, window_bounds = array<i64: 32, 96>}, {pipeline_mode = #tpu.pipeline_mode<synchronous>, transform_indices = @transform_2, window_bounds = array<i64: 1, 96>}, {pipeline_mode = #tpu.pipeline_mode<synchronous>, transform_indices = @transform_3, window_bounds = array<i64: 32, 32>}, {pipeline_mode = #tpu.pipeline_mode<synchronous>, transform_indices = @transform_4, window_bounds = array<i64: 1, 32>}, {pipeline_mode = #tpu.pipeline_mode<synchronous>, transform_indices = @transform_5, window_bounds = array<i64: 1, 32>}, {pipeline_mode = #tpu.pipeline_mode<synchronous>, transform_indices = @transform_6, window_bounds = array<i64: 1, 32>}, {pipeline_mode = #tpu.pipeline_mode<synchronous>, transform_indices = @transform_7, window_bounds = array<i64: 1, 32>}, {pipeline_mode = #tpu.pipeline_mode<synchronous>, transform_indices = @transform_8, window_bounds = array<i64: 1, 32>}, {pipeline_mode = #tpu.pipeline_mode<synchronous>, transform_indices = @transform_9, window_bounds = array<i64: 32, 64>}, {pipeline_mode = #tpu.pipeline_mode<synchronous>, transform_indices = @transform_10, window_bounds = array<i64: 1, 64>}, {pipeline_mode = #tpu.pipeline_mode<synchronous>, transform_indices = @transform_11, window_bounds = array<i64: 64, 32>}, {pipeline_mode = #tpu.pipeline_mode<synchronous>, transform_indices = @transform_12, window_bounds = array<i64: 1, 32>}, {transform_indices = @transform_13, window_bounds = array<i64: 1, 24, 32>}]} {
    %c0 = arith.constant 0 : index
    %c0_0 = arith.constant 0 : index
    %c0_1 = arith.constant 0 : index
    %0 = vector.load %arg1[%c0, %c0_0, %c0_1] : memref<1x24x32xf32, #tpu.memory_space<vmem>>, vector<1x24x32xf32>
    %1 = vector.shape_cast %0 : vector<1x24x32xf32> to vector<24x32xf32>
    %c0_2 = arith.constant 0 : index
    %c0_3 = arith.constant 0 : index
    %2 = vector.load %arg6[%c0_2, %c0_3] : memref<1x32xf32, #tpu.memory_space<vmem>>, vector<1x32xf32>
    %c0_4 = arith.constant 0 : index
    %c0_5 = arith.constant 0 : index
    %3 = vector.load %arg7[%c0_4, %c0_5] : memref<1x32xf32, #tpu.memory_space<vmem>>, vector<1x32xf32>
    %cst = arith.constant dense<0.000000e+00> : vector<24xf32>
    %4 = vector.multi_reduction <add>, %1, %cst [1] : vector<24x32xf32> to vector<24xf32>
    %5 = vector.shape_cast %4 : vector<24xf32> to vector<24x1xf32>
    %cst_6 = arith.constant 3.200000e+01 : f32
    %6 = vector.broadcast %cst_6 : f32 to vector<24x1xf32>
    %7 = arith.divf %5, %6 : vector<24x1xf32>
    %8 = vector.broadcast %7 : vector<24x1xf32> to vector<24x32xf32>
    %9 = arith.subf %1, %8 : vector<24x32xf32>
    %10 = arith.mulf %9, %9 : vector<24x32xf32>
    %cst_7 = arith.constant dense<0.000000e+00> : vector<24xf32>
    %11 = vector.multi_reduction <add>, %10, %cst_7 [1] : vector<24x32xf32> to vector<24xf32>
    %12 = vector.shape_cast %11 : vector<24xf32> to vector<24x1xf32>
    %cst_8 = arith.constant 3.200000e+01 : f32
    %13 = vector.broadcast %cst_8 : f32 to vector<24x1xf32>
    %14 = arith.divf %12, %13 : vector<24x1xf32>
    %15 = vector.broadcast %7 : vector<24x1xf32> to vector<24x32xf32>
    %16 = arith.subf %1, %15 : vector<24x32xf32>
    %cst_9 = arith.constant 9.99999974E-6 : f32
    %17 = vector.broadcast %cst_9 : f32 to vector<24x1xf32>
    %18 = arith.addf %14, %17 : vector<24x1xf32>
    %19 = math.rsqrt %18 : vector<24x1xf32>
    %20 = vector.broadcast %19 : vector<24x1xf32> to vector<24x32xf32>
    %21 = arith.mulf %16, %20 : vector<24x32xf32>
    %22 = vector.broadcast %2 : vector<1x32xf32> to vector<24x32xf32>
    %23 = arith.mulf %21, %22 : vector<24x32xf32>
    %24 = vector.broadcast %3 : vector<1x32xf32> to vector<24x32xf32>
    %25 = arith.addf %23, %24 : vector<24x32xf32>
    %26 = arith.truncf %25 : vector<24x32xf32> to vector<24x32xbf16>
    %c0_10 = arith.constant 0 : index
    %c0_11 = arith.constant 0 : index
    %27 = vector.load %arg2[%c0_10, %c0_11] : memref<32x96xbf16, #tpu.memory_space<vmem>>, vector<32x96xbf16>
    %cst_12 = arith.constant dense<0.000000e+00> : vector<24x96xf32>
    %28 = tpu.matmul %26, %27, %cst_12 {dimension_numbers = #tpu.dot_dimension_numbers<[1], [0], [0], [1], [0, 0, 1, 1], [], []>} : vector<24x32xbf16>, vector<32x96xbf16>, vector<24x96xf32> -> vector<24x96xf32>
    %c0_13 = arith.constant 0 : index
    %c0_14 = arith.constant 0 : index
    %29 = vector.load %arg3[%c0_13, %c0_14] : memref<1x96xf32, #tpu.memory_space<vmem>>, vector<1x96xf32>
    %30 = vector.broadcast %29 : vector<1x96xf32> to vector<24x96xf32>
    %31 = arith.addf %28, %30 : vector<24x96xf32>
    %32 = vector.extract_strided_slice %31 {offsets = [0, 0], sizes = [24, 32], strides = [1, 1]} : vector<24x96xf32> to vector<24x32xf32>
    %33 = vector.shape_cast %32 : vector<24x32xf32> to vector<24x4x8xf32>
    %34 = tpu.transpose %33, [1, 0, 2] : vector<24x4x8xf32> -> vector<4x24x8xf32>
    %35 = arith.truncf %34 : vector<4x24x8xf32> to vector<4x24x8xbf16>
    %36 = vector.extract_strided_slice %31 {offsets = [0, 32], sizes = [24, 32], strides = [1, 1]} : vector<24x96xf32> to vector<24x32xf32>
    %37 = vector.shape_cast %36 : vector<24x32xf32> to vector<24x4x8xf32>
    %38 = tpu.transpose %37, [1, 0, 2] : vector<24x4x8xf32> -> vector<4x24x8xf32>
    %39 = arith.truncf %38 : vector<4x24x8xf32> to vector<4x24x8xbf16>
    %40 = vector.extract_strided_slice %31 {offsets = [0, 64], sizes = [24, 32], strides = [1, 1]} : vector<24x96xf32> to vector<24x32xf32>
    %41 = vector.shape_cast %40 : vector<24x32xf32> to vector<24x4x8xf32>
    %42 = tpu.transpose %41, [1, 0, 2] : vector<24x4x8xf32> -> vector<4x24x8xf32>
    %43 = arith.truncf %42 : vector<4x24x8xf32> to vector<4x24x8xbf16>
    "tpu.trace_start"() <{level = 10 : i32, message = "hqd,hkd->hqk"}> : () -> ()
    %cst_15 = arith.constant dense<0.000000e+00> : vector<4x24x24xf32>
    %44 = tpu.matmul %35, %39, %cst_15 {dimension_numbers = #tpu.dot_dimension_numbers<[2], [2], [1], [1], [0, 0, 0, 1, 1, 1], [0], [0]>} : vector<4x24x8xbf16>, vector<4x24x8xbf16>, vector<4x24x24xf32> -> vector<4x24x24xf32>
    "tpu.trace_stop"() : () -> ()
    %cst_16 = arith.constant 0.353553385 : f32
    %45 = vector.broadcast %cst_16 : f32 to vector<4x24x24xf32>
    %46 = arith.mulf %44, %45 : vector<4x24x24xf32>
    %cst_17 = arith.constant dense<0xFF800000> : vector<4x24xf32>
    %47 = vector.multi_reduction <maximumf>, %46, %cst_17 [2] : vector<4x24x24xf32> to vector<4x24xf32>
    %48 = vector.shape_cast %47 : vector<4x24xf32> to vector<4x24x1xf32>
    %49 = vector.broadcast %48 : vector<4x24x1xf32> to vector<4x24x24xf32>
    %50 = arith.subf %46, %49 : vector<4x24x24xf32>
    %51 = math.exp %50 : vector<4x24x24xf32>
    %cst_18 = arith.constant dense<0.000000e+00> : vector<4x24xf32>
    %52 = vector.multi_reduction <add>, %51, %cst_18 [2] : vector<4x24x24xf32> to vector<4x24xf32>
    %53 = vector.shape_cast %52 : vector<4x24xf32> to vector<4x24x1xf32>
    %54 = tpu.reciprocal %53 : vector<4x24x1xf32> -> vector<4x24x1xf32>
    %55 = vector.broadcast %54 : vector<4x24x1xf32> to vector<4x24x24xf32>
    %56 = arith.mulf %51, %55 : vector<4x24x24xf32>
    %57 = arith.truncf %56 : vector<4x24x24xf32> to vector<4x24x24xbf16>
    "tpu.trace_start"() <{level = 10 : i32, message = "hqk,hkd->hqd"}> : () -> ()
    %cst_19 = arith.constant dense<0.000000e+00> : vector<4x24x8xf32>
    %58 = tpu.matmul %57, %43, %cst_19 {dimension_numbers = #tpu.dot_dimension_numbers<[2], [1], [1], [2], [0, 0, 0, 1, 1, 2], [0], [0]>} : vector<4x24x24xbf16>, vector<4x24x8xbf16>, vector<4x24x8xf32> -> vector<4x24x8xf32>
    "tpu.trace_stop"() : () -> ()
    %59 = tpu.transpose %58, [1, 0, 2] : vector<4x24x8xf32> -> vector<24x4x8xf32>
    %60 = vector.shape_cast %59 : vector<24x4x8xf32> to vector<24x32xf32>
    %61 = arith.truncf %60 : vector<24x32xf32> to vector<24x32xbf16>
    %c0_20 = arith.constant 0 : index
    %c0_21 = arith.constant 0 : index
    %62 = vector.load %arg4[%c0_20, %c0_21] : memref<32x32xbf16, #tpu.memory_space<vmem>>, vector<32x32xbf16>
    %cst_22 = arith.constant dense<0.000000e+00> : vector<24x32xf32>
    %63 = tpu.matmul %61, %62, %cst_22 {dimension_numbers = #tpu.dot_dimension_numbers<[1], [0], [0], [1], [0, 0, 1, 1], [], []>} : vector<24x32xbf16>, vector<32x32xbf16>, vector<24x32xf32> -> vector<24x32xf32>
    %c0_23 = arith.constant 0 : index
    %c0_24 = arith.constant 0 : index
    %64 = vector.load %arg5[%c0_23, %c0_24] : memref<1x32xf32, #tpu.memory_space<vmem>>, vector<1x32xf32>
    %65 = vector.broadcast %64 : vector<1x32xf32> to vector<24x32xf32>
    %66 = arith.addf %63, %65 : vector<24x32xf32>
    %67 = arith.addf %1, %66 : vector<24x32xf32>
    %c0_25 = arith.constant 0 : index
    %c0_26 = arith.constant 0 : index
    %68 = vector.load %arg8[%c0_25, %c0_26] : memref<1x32xf32, #tpu.memory_space<vmem>>, vector<1x32xf32>
    %c0_27 = arith.constant 0 : index
    %c0_28 = arith.constant 0 : index
    %69 = vector.load %arg9[%c0_27, %c0_28] : memref<1x32xf32, #tpu.memory_space<vmem>>, vector<1x32xf32>
    %cst_29 = arith.constant dense<0.000000e+00> : vector<24xf32>
    %70 = vector.multi_reduction <add>, %67, %cst_29 [1] : vector<24x32xf32> to vector<24xf32>
    %71 = vector.shape_cast %70 : vector<24xf32> to vector<24x1xf32>
    %cst_30 = arith.constant 3.200000e+01 : f32
    %72 = vector.broadcast %cst_30 : f32 to vector<24x1xf32>
    %73 = arith.divf %71, %72 : vector<24x1xf32>
    %74 = vector.broadcast %73 : vector<24x1xf32> to vector<24x32xf32>
    %75 = arith.subf %67, %74 : vector<24x32xf32>
    %76 = arith.mulf %75, %75 : vector<24x32xf32>
    %cst_31 = arith.constant dense<0.000000e+00> : vector<24xf32>
    %77 = vector.multi_reduction <add>, %76, %cst_31 [1] : vector<24x32xf32> to vector<24xf32>
    %78 = vector.shape_cast %77 : vector<24xf32> to vector<24x1xf32>
    %cst_32 = arith.constant 3.200000e+01 : f32
    %79 = vector.broadcast %cst_32 : f32 to vector<24x1xf32>
    %80 = arith.divf %78, %79 : vector<24x1xf32>
    %81 = vector.broadcast %73 : vector<24x1xf32> to vector<24x32xf32>
    %82 = arith.subf %67, %81 : vector<24x32xf32>
    %cst_33 = arith.constant 9.99999974E-6 : f32
    %83 = vector.broadcast %cst_33 : f32 to vector<24x1xf32>
    %84 = arith.addf %80, %83 : vector<24x1xf32>
    %85 = math.rsqrt %84 : vector<24x1xf32>
    %86 = vector.broadcast %85 : vector<24x1xf32> to vector<24x32xf32>
    %87 = arith.mulf %82, %86 : vector<24x32xf32>
    %88 = vector.broadcast %68 : vector<1x32xf32> to vector<24x32xf32>
    %89 = arith.mulf %87, %88 : vector<24x32xf32>
    %90 = vector.broadcast %69 : vector<1x32xf32> to vector<24x32xf32>
    %91 = arith.addf %89, %90 : vector<24x32xf32>
    %92 = arith.truncf %91 : vector<24x32xf32> to vector<24x32xbf16>
    %c0_34 = arith.constant 0 : index
    %c0_35 = arith.constant 0 : index
    %93 = vector.load %arg10[%c0_34, %c0_35] : memref<32x64xbf16, #tpu.memory_space<vmem>>, vector<32x64xbf16>
    %cst_36 = arith.constant dense<0.000000e+00> : vector<24x64xf32>
    %94 = tpu.matmul %92, %93, %cst_36 {dimension_numbers = #tpu.dot_dimension_numbers<[1], [0], [0], [1], [0, 0, 1, 1], [], []>} : vector<24x32xbf16>, vector<32x64xbf16>, vector<24x64xf32> -> vector<24x64xf32>
    %c0_37 = arith.constant 0 : index
    %c0_38 = arith.constant 0 : index
    %95 = vector.load %arg11[%c0_37, %c0_38] : memref<1x64xf32, #tpu.memory_space<vmem>>, vector<1x64xf32>
    %96 = vector.broadcast %95 : vector<1x64xf32> to vector<24x64xf32>
    %97 = arith.addf %94, %96 : vector<24x64xf32>
    %cst_39 = arith.constant 5.000000e-01 : f32
    %98 = vector.broadcast %cst_39 : f32 to vector<24x64xf32>
    %99 = arith.mulf %98, %97 : vector<24x64xf32>
    %cst_40 = arith.constant 0.707106769 : f32
    %100 = vector.broadcast %cst_40 : f32 to vector<24x64xf32>
    %101 = arith.mulf %97, %100 : vector<24x64xf32>
    %102 = math.erf %101 : vector<24x64xf32>
    %cst_41 = arith.constant 1.000000e+00 : f32
    %103 = vector.broadcast %cst_41 : f32 to vector<24x64xf32>
    %104 = arith.addf %103, %102 : vector<24x64xf32>
    %105 = arith.mulf %99, %104 : vector<24x64xf32>
    %106 = arith.truncf %105 : vector<24x64xf32> to vector<24x64xbf16>
    %c0_42 = arith.constant 0 : index
    %c0_43 = arith.constant 0 : index
    %107 = vector.load %arg12[%c0_42, %c0_43] : memref<64x32xbf16, #tpu.memory_space<vmem>>, vector<64x32xbf16>
    %cst_44 = arith.constant dense<0.000000e+00> : vector<24x32xf32>
    %108 = tpu.matmul %106, %107, %cst_44 {dimension_numbers = #tpu.dot_dimension_numbers<[1], [0], [0], [1], [0, 0, 1, 1], [], []>} : vector<24x64xbf16>, vector<64x32xbf16>, vector<24x32xf32> -> vector<24x32xf32>
    %c0_45 = arith.constant 0 : index
    %c0_46 = arith.constant 0 : index
    %109 = vector.load %arg13[%c0_45, %c0_46] : memref<1x32xf32, #tpu.memory_space<vmem>>, vector<1x32xf32>
    %110 = vector.broadcast %109 : vector<1x32xf32> to vector<24x32xf32>
    %111 = arith.addf %108, %110 : vector<24x32xf32>
    %112 = arith.addf %67, %111 : vector<24x32xf32>
    %c0_47 = arith.constant 0 : index
    %c0_48 = arith.constant 0 : index
    %c0_49 = arith.constant 0 : index
    %113 = vector.load %arg14[%c0_47, %c0_48, %c0_49] : memref<1x24x32xf32, #tpu.memory_space<vmem>>, vector<1x24x32xf32>
    %114 = vector.shape_cast %113 : vector<1x24x32xf32> to vector<24x32xf32>
    %115 = vector.shape_cast %112 : vector<24x32xf32> to vector<1x24x32xf32>
    tpu.vector_store %arg14[%c0_47, %c0_48, %c0_49], %115 {strides = array<i32>} : memref<1x24x32xf32, #tpu.memory_space<vmem>>, vector<1x24x32xf32>,
    return
  }
  func.func @transform_0(%arg0: i32) -> (i32, i32, i32) {
    %c0_i32 = arith.constant 0 : i32
    %c0_i32_0 = arith.constant 0 : i32
    %c0_i32_1 = arith.constant 0 : i32
    return %arg0, %c0_i32, %c0_i32_0 : i32, i32, i32
  }
  func.func @transform_1(%arg0: i32) -> (i32, i32) {
    %c0_i32 = arith.constant 0 : i32
    %c0_i32_0 = arith.constant 0 : i32
    %c0_i32_1 = arith.constant 0 : i32
    return %c0_i32, %c0_i32_0 : i32, i32
  }
  func.func @transform_2(%arg0: i32) -> (i32, i32) {
    %c0_i32 = arith.constant 0 : i32
    %c0_i32_0 = arith.constant 0 : i32
    %c0_i32_1 = arith.constant 0 : i32
    return %c0_i32, %c0_i32_0 : i32, i32
  }
  func.func @transform_3(%arg0: i32) -> (i32, i32) {
    %c0_i32 = arith.constant 0 : i32
    %c0_i32_0 = arith.constant 0 : i32
    %c0_i32_1 = arith.constant 0 : i32
    return %c0_i32, %c0_i32_0 : i32, i32
  }
  func.func @transform_4(%arg0: i32) -> (i32, i32) {
    %c0_i32 = arith.constant 0 : i32
    %c0_i32_0 = arith.constant 0 : i32
    %c0_i32_1 = arith.constant 0 : i32
    return %c0_i32, %c0_i32_0 : i32, i32
  }
  func.func @transform_5(%arg0: i32) -> (i32, i32) {
    %c0_i32 = arith.constant 0 : i32
    %c0_i32_0 = arith.constant 0 : i32
    %c0_i32_1 = arith.constant 0 : i32
    return %c0_i32, %c0_i32_0 : i32, i32
  }
  func.func @transform_6(%arg0: i32) -> (i32, i32) {
    %c0_i32 = arith.constant 0 : i32
    %c0_i32_0 = arith.constant 0 : i32
    %c0_i32_1 = arith.constant 0 : i32
    return %c0_i32, %c0_i32_0 : i32, i32
  }
  func.func @transform_7(%arg0: i32) -> (i32, i32) {
    %c0_i32 = arith.constant 0 : i32
    %c0_i32_0 = arith.constant 0 : i32
    %c0_i32_1 = arith.constant 0 : i32
    return %c0_i32, %c0_i32_0 : i32, i32
  }
  func.func @transform_8(%arg0: i32) -> (i32, i32) {
    %c0_i32 = arith.constant 0 : i32
    %c0_i32_0 = arith.constant 0 : i32
    %c0_i32_1 = arith.constant 0 : i32
    return %c0_i32, %c0_i32_0 : i32, i32
  }
  func.func @transform_9(%arg0: i32) -> (i32, i32) {
    %c0_i32 = arith.constant 0 : i32
    %c0_i32_0 = arith.constant 0 : i32
    %c0_i32_1 = arith.constant 0 : i32
    return %c0_i32, %c0_i32_0 : i32, i32
  }
  func.func @transform_10(%arg0: i32) -> (i32, i32) {
    %c0_i32 = arith.constant 0 : i32
    %c0_i32_0 = arith.constant 0 : i32
    %c0_i32_1 = arith.constant 0 : i32
    return %c0_i32, %c0_i32_0 : i32, i32
  }
  func.func @transform_11(%arg0: i32) -> (i32, i32) {
    %c0_i32 = arith.constant 0 : i32
    %c0_i32_0 = arith.constant 0 : i32
    %c0_i32_1 = arith.constant 0 : i32
    return %c0_i32, %c0_i32_0 : i32, i32
  }
  func.func @transform_12(%arg0: i32) -> (i32, i32) {
    %c0_i32 = arith.constant 0 : i32
    %c0_i32_0 = arith.constant 0 : i32
    %c0_i32_1 = arith.constant 0 : i32
    return %c0_i32, %c0_i32_0 : i32, i32
  }
  func.func @transform_13(%arg0: i32) -> (i32, i32, i32) {
    %c0_i32 = arith.constant 0 : i32
    %c0_i32_0 = arith.constant 0 : i32
    %c0_i32_1 = arith.constant 0 : i32
    return %arg0, %c0_i32, %c0_i32_0 : i32, i32, i32
  }
}

</mosaic_0001>

<bundles_post_ra>
// kernel: tpu_custom_call.1
= control target key start
LH: loop header
LB: loop body
LE: loop exit
PB: predicated region body
PF: predicated region fallthrough
CT: control target
= control target key end

     0   :  { %s5893_s0 = inlined_call_operand.hbm [shape: f32[2,24,32], index: 0, kind: input, shape index: {}]   ;;  %s5894_s1 = inlined_call_operand.hbm [shape: bf16[32,96], index: 1, kind: input, shape index: {}]   ;;  %s5895_s2 = inlined_call_operand.hbm [shape: f32[1,96], index: 2, kind: input, shape index: {}]   ;;  %s5896_s3 = inlined_call_operand.hbm [shape: bf16[32,32], index: 3, kind: input, shape index: {}]   ;;  %s5897_s4 = inlined_call_operand.hbm [shape: f32[1,32], index: 4, kind: input, shape index: {}]   ;;  %s5898_s5 = inlined_call_operand.hbm [shape: f32[1,32], index: 5, kind: input, shape index: {}]   ;;  %s5899_s6 = inlined_call_operand.hbm [shape: f32[1,32], index: 6, kind: input, shape index: {}]   ;;  %s5900_s7 = inlined_call_operand.hbm [shape: f32[1,32], index: 7, kind: input, shape index: {}]   ;;  %s5901_s8 = inlined_call_operand.hbm [shape: f32[1,32], index: 8, kind: input, shape index: {}]   ;;  %s5902_s9 = inlined_call_operand.hbm [shape: bf16[32,64], index: 9, kind: input, shape index: {}]   ;;  %s5903_s10 = inlined_call_operand.hbm [shape: f32[1,64], index: 10, kind: input, shape index: {}]   ;;  %s5904_s11 = inlined_call_operand.hbm [shape: bf16[64,32], index: 11, kind: input, shape index: {}]   ;;  %s5905_s12 = inlined_call_operand.hbm [shape: f32[1,32], index: 12, kind: input, shape index: {}]   ;;  %s5906_s13 = inlined_call_operand.hbm [shape: f32[2,24,32], index: 13, kind: output, shape index: {}]  }
   0x1   :  { %5918 = sst [smem:[#allocation35_spill]] %s5893_s0 }
   0x2   :  { %5919 = sst [smem:[#allocation36_spill]] %s5894_s1 }
   0x3   :  { %5920 = sst [smem:[#allocation37_spill]] %s5895_s2 }
   0x4   :  { %5921 = sst [smem:[#allocation38_spill]] %s5896_s3 }
   0x5   :  { %5922 = sst [smem:[#allocation39_spill]] %s5906_s13 }
   0x6   :  { %18 = vsyncpa [#allocation3], 0 }
   0x7   :  { %20 = vsyncpa [#allocation3 + $0x1], 0 }
   0x8   :  { %21 = vsyncpa [#allocation6], 0 }
   0x9   :  { %22 = vsyncpa [#allocation9], 0 }
   0xa   :  { %23 = vsyncpa [#allocation12], 0 }
   0xb   :  { %24 = vsyncpa [#allocation15], 0 }
   0xc   :  { %25 = vsyncpa [#allocation18], 0 }
   0xd   :  { %26 = vsyncpa [#allocation21], 0 }
   0xe   :  { %27 = vsyncpa [#allocation4], 0 }
   0xf   :  { %29 = vsyncpa [#allocation4 + $0x1], 0  ;;  %s4823_s25 = smov 0   ;;  %s4825_s26 = smov 0  }
  0x10   :  { %s4827_s27 = smov 0   ;;  %s4829_s28 = smov 0  }
  0x11 LB: > { %5923 = sst [smem:[#allocation32_spill]] %s4710_s25  ;;  %s4724_s29 = smov [#allocation5]   ;;  %s4722_s28 = sphi %s4829_s28, %s5964_s28   ;;  %s4718_s27 = sphi %s4827_s27, %s5963_s27   ;;  %s4714_s26 = sphi %s4825_s26, %s5962_s26   ;;  %s4710_s25 = sphi %s4823_s25, %s5961_s25  }
  0x12   : > { %s356_s30 = sshll.u32 %s4724_s29, 4  ;;  %s4844_s14 = sadd.s32 4294967295, %s4722_s28   ;;  %s4849_s30 = int_to_ptr.vmem [resolvable:$true] %s356_s30 }
  0x13   : > { %5924 = sst [smem:[#allocation33_spill]] %s4844_s14  ;;  %p3727_p0 = scmp.ge.s32.totalorder %s4722_s28, 1 }
  0x14   : > { %p5915_p1 = scmp.eq.s32.totalorder %s4844_s14, 0  ;;  %p344_p2 = scmp.lt.s32.totalorder %s4722_s28, 3 }
  0x15   : > { %s4725_s16 = smov [#allocation8]   ;;  %s4726_s19 = smov [#allocation11]  }
  0x16   : > { %p4851_p3 = pnand %p3727_p0, %p344_p2  ;;  %s380_s17 = sshll.u32 %s4725_s16, 4  ;;  %s4864_s17 = int_to_ptr.vmem [resolvable:$true] %s380_s17 }
  0x17   : > { %s405_s20 = sshll.u32 %s4726_s19, 4  ;;  %s5928_s1 = sld [smem:[#allocation36_spill]]  ;;  %s4866_s20 = int_to_ptr.vmem [resolvable:$true] %s405_s20 }
  0x18   : > { %s5925_s15 = scalar_select %p4851_p3, 1, 0 }
  0x19   : > { %p4042_p5 = pneg %p4851_p3 }
  0x1a   : > { %5926 = sst [smem:[#allocation34_spill]] %s5925_s15 }
  0x1b   : > { %p4860_p6 = pnand %p4042_p5, %p5915_p1 }
  0x1d   : > { %s4266_s23 = scalar_lea.hbm %s5928_s1, 256  ;;  %p4876_p8 = pneg %p4860_p6 }
  0x1e   : > { %p4267_p7 = scmp.ne.s32.totalorder %s5928_s1, %s4266_s23  ;;  %p4273_p11 = scmp.lt.u32.totalorder %s4266_s23, %s5928_s1 }
  0x20   : > { %p4269_p9 = pnand %p4876_p8, %p4267_p7 }
  0x22   : > { %p4270_p10 = pneg %p4269_p9 }
  0x24   : > { %p4275_p12 = pnand %p4273_p11, %p4270_p10 }
  0x26   : > { %4278 = shalt.err (!%p4275_p12)
}
  0x27   : > { %s4279_s21 = scalar_lea.vmem %s4849_s30, 256  ;;  %p4287_p5 = scmp.lt.s32.totalorder %s4849_s30, %s4849_s30 }
  0x28   : > { %p4280_p13 = scmp.ne.s32.totalorder %s4849_s30, %s4279_s21  ;;  %p4288_p4 = scmp.lt.s32.totalorder %s4279_s21, %s4279_s21 }
  0x2a   : > { %p4282_p0 = pnand %p4280_p13, %p4876_p8  ;;  %p4289_p7 = por %p4288_p4, %p4287_p5 }
  0x2c   : > { %p4283_p2 = pneg %p4282_p0 }
  0x2e   : > { %p4290_p9 = pnand %p4289_p7, %p4283_p2 }
  0x30   : > { %4293 = shalt.err (!%p4290_p9)
}
  0x31   : > { %s5913_s22 = smov 64   ;;  %s4728_s13 = smov 4  }
  0x32   : > { %4045 = dma.hbm_to_vmem [thread:$0]  (!%p4860_p6), %s5928_s1, 256, %s4849_s30, [#allocation6], %s5913_s22, %s5913_s22, %s4728_s13  }
  0x33   : > { %s5930_s3 = sld [smem:[#allocation38_spill]] }
  0x39   : > { %s4294_s21 = scalar_lea.hbm %s5930_s3, 256 }
  0x3a   : > { %p4295_p4 = scmp.ne.s32.totalorder %s5930_s3, %s4294_s21  ;;  %p4301_p12 = scmp.lt.u32.totalorder %s4294_s21, %s5930_s3 }
  0x3c   : > { %p4297_p10 = pnand %p4295_p4, %p4876_p8 }
  0x3e   : > { %p4298_p11 = pneg %p4297_p10 }
  0x40   : > { %p4303_p13 = pnand %p4301_p12, %p4298_p11 }
  0x42   : > { %4306 = shalt.err (!%p4303_p13)
}
  0x43   : > { %s4307_s30 = scalar_lea.vmem %s4864_s17, 256  ;;  %p4315_p7 = scmp.lt.s32.totalorder %s4864_s17, %s4864_s17 }
  0x44   : > { %p4308_p0 = scmp.ne.s32.totalorder %s4864_s17, %s4307_s30  ;;  %p4316_p9 = scmp.lt.s32.totalorder %s4307_s30, %s4307_s30 }
  0x46   : > { %p4310_p2 = pnand %p4308_p0, %p4876_p8  ;;  %p4317_p4 = por %p4316_p9, %p4315_p7 }
  0x48   : > { %p4311_p5 = pneg %p4310_p2 }
  0x4a   : > { %p4318_p10 = pnand %p4317_p4, %p4311_p5 }
  0x4c   : > { %4321 = shalt.err (!%p4318_p10)
}
  0x4d   : > { %4051 = dma.hbm_to_vmem [thread:$0]  (!%p4860_p6), %s5930_s3, 256, %s4864_s17, [#allocation9], %s5913_s22, %s5913_s22, %s4728_s13  }
  0x4e   : > { %s4322_s23 = scalar_lea.hbm %s5898_s5, 16 }
  0x4f   : > { %p4323_p11 = scmp.ne.s32.totalorder %s5898_s5, %s4322_s23  ;;  %p4329_p0 = scmp.lt.u32.totalorder %s4322_s23, %s5898_s5 }
  0x51   : > { %p4325_p12 = pnand %p4323_p11, %p4876_p8 }
  0x53   : > { %p4326_p13 = pneg %p4325_p12 }
  0x55   : > { %p4331_p2 = pnand %p4329_p0, %p4326_p13 }
  0x57   : > { %4334 = shalt.err (!%p4331_p2)
}
  0x58   : > { %s4335_s17 = scalar_lea.vmem %s4866_s20, 16  ;;  %s4342_s30 = scalar_lea.vmem %s4866_s20, 32 }
  0x59   : > { %p4336_p5 = scmp.ne.s32.totalorder %s4866_s20, %s4335_s17  ;;  %p4343_p4 = scmp.lt.s32.totalorder %s4866_s20, %s4866_s20 }
  0x5a   : > { %p4344_p10 = scmp.lt.s32.totalorder %s4342_s30, %s4335_s17 }
  0x5b   : > { %p4338_p7 = pnand %p4336_p5, %p4876_p8 }
  0x5c   : > { %p4345_p11 = por %p4344_p10, %p4343_p4 }
  0x5d   : > { %p4339_p9 = pneg %p4338_p7 }
  0x5f   : > { %p4346_p12 = pnand %p4345_p11, %p4339_p9 }
  0x61   : > { %4349 = shalt.err (!%p4346_p12)
}
  0x62   : > { %4057 = dma.hbm_to_vmem [thread:$0]  (!%p4860_p6), %s5898_s5, 16, %s4866_s20, [#allocation12]  }
  0x63   : > { %s4729_s14 = smov [#allocation14]   ;;  %s4730_s23 = smov [#allocation17]  }
  0x64   : > { %s427_s15 = sshll.u32 %s4729_s14, 4  ;;  %s448_s24 = sshll.u32 %s4730_s23, 4  ;;  %s428_s15 = int_to_ptr.vmem [resolvable:$true] %s427_s15  ;;  %s449_s24 = int_to_ptr.vmem [resolvable:$true] %s448_s24 }
  0x65   : > { %s4350_s21 = scalar_lea.hbm %s5900_s7, 16 }
  0x66   : > { %p4351_p13 = scmp.ne.s32.totalorder %s5900_s7, %s4350_s21  ;;  %p4357_p5 = scmp.lt.u32.totalorder %s4350_s21, %s5900_s7 }
  0x68   : > { %p4353_p0 = pnand %p4351_p13, %p4876_p8 }
  0x6a   : > { %p4354_p2 = pneg %p4353_p0 }
  0x6c   : > { %p4359_p7 = pnand %p4357_p5, %p4354_p2 }
  0x6e   : > { %4362 = shalt.err (!%p4359_p7)
}
  0x6f   : > { %s4363_s20 = scalar_lea.vmem %s428_s15, 16  ;;  %s4370_s25 = scalar_lea.vmem %s428_s15, 32 }
  0x70   : > { %p4364_p9 = scmp.ne.s32.totalorder %s428_s15, %s4363_s20  ;;  %p4371_p11 = scmp.lt.s32.totalorder %s428_s15, %s428_s15 }
  0x71   : > { %p4372_p12 = scmp.lt.s32.totalorder %s4370_s25, %s4363_s20 }
  0x72   : > { %p4366_p4 = pnand %p4364_p9, %p4876_p8 }
  0x73   : > { %p4373_p1 = por %p4372_p12, %p4371_p11 }
  0x74   : > { %p4367_p10 = pneg %p4366_p4 }
  0x76   : > { %p4374_p3 = pnand %p4373_p1, %p4367_p10 }
  0x78   : > { %4377 = shalt.err (!%p4374_p3)
}
  0x79   : > { %4063 = dma.hbm_to_vmem [thread:$0]  (!%p4860_p6), %s5900_s7, 16, %s428_s15, [#allocation15]  }
  0x7a   : > { %s4378_s19 = scalar_lea.hbm %s5902_s9, 256 }
  0x7b   : > { %p4379_p13 = scmp.ne.s32.totalorder %s5902_s9, %s4378_s19  ;;  %p4385_p3 = scmp.lt.u32.totalorder %s4378_s19, %s5902_s9 }
  0x7d   : > { %p4381_p0 = pnand %p4379_p13, %p4876_p8 }
  0x7f   : > { %p4382_p1 = pneg %p4381_p0 }
  0x81   : > { %p4387_p2 = pnand %p4385_p3, %p4382_p1 }
  0x83   : > { %4390 = shalt.err (!%p4387_p2)
}
  0x84   : > { %s4391_s20 = scalar_lea.vmem %s449_s24, 256  ;;  %p4399_p4 = scmp.lt.s32.totalorder %s449_s24, %s449_s24 }
  0x85   : > { %p4392_p5 = scmp.ne.s32.totalorder %s449_s24, %s4391_s20  ;;  %p4400_p10 = scmp.lt.s32.totalorder %s4391_s20, %s4391_s20 }
  0x87   : > { %p4394_p7 = pnand %p4392_p5, %p4876_p8  ;;  %p4401_p11 = por %p4400_p10, %p4399_p4 }
  0x89   : > { %p4395_p9 = pneg %p4394_p7 }
  0x8b   : > { %p4402_p12 = pnand %p4401_p11, %p4395_p9 }
  0x8d   : > { %4405 = shalt.err (!%p4402_p12)
}
  0x8e   : > { %s5931_s15 = smov 64   ;;  %s4731_s23 = smov [#allocation20]  }
  0x8f   : > { %4069 = dma.hbm_to_vmem [thread:$0]  (!%p4860_p6), %s5902_s9, 256, %s449_s24, [#allocation18], %s5931_s15, %s5931_s15, %s4728_s13  }
  0x90   : > { %s472_s22 = sshll.u32 %s4731_s23, 4  ;;  %s4732_s29 = smov [#allocation7]   ;;  %s473_s22 = int_to_ptr.vmem [resolvable:$true] %s472_s22 }
  0x91   : > { %s370_s19 = sshll.u32 %s4732_s29, 4  ;;  %s4406_s30 = scalar_lea.hbm %s5904_s11, 512  ;;  %s371_s19 = int_to_ptr.vmem [resolvable:$true] %s370_s19 }
  0x92   : > { %p4407_p13 = scmp.ne.s32.totalorder %s5904_s11, %s4406_s30  ;;  %p4413_p3 = scmp.lt.u32.totalorder %s4406_s30, %s5904_s11 }
  0x94   : > { %p4409_p0 = pnand %p4407_p13, %p4876_p8 }
  0x96   : > { %p4410_p1 = pneg %p4409_p0 }
  0x98   : > { %p4415_p2 = pnand %p4413_p3, %p4410_p1 }
  0x9a   : > { %4418 = shalt.err (!%p4415_p2)
}
  0x9b   : > { %s4419_s24 = scalar_lea.vmem %s473_s22, 512  ;;  %p4427_p4 = scmp.lt.s32.totalorder %s473_s22, %s473_s22 }
  0x9c   : > { %p4420_p5 = scmp.ne.s32.totalorder %s473_s22, %s4419_s24  ;;  %p4428_p10 = scmp.lt.s32.totalorder %s4419_s24, %s4419_s24 }
  0x9e   : > { %p4422_p7 = pnand %p4420_p5, %p4876_p8  ;;  %p4429_p11 = por %p4428_p10, %p4427_p4 }
  0xa0   : > { %p4423_p9 = pneg %p4422_p7 }
  0xa2   : > { %p4430_p12 = pnand %p4429_p11, %p4423_p9 }
  0xa4   : > { %4433 = shalt.err (!%p4430_p12)
}
  0xa5   : > { %4075 = dma.hbm_to_vmem [thread:$0]  (!%p4860_p6), %s5904_s11, 512, %s473_s22, [#allocation21], %s5931_s15, %s5931_s15, %s4728_s13  }
  0xa6   : > { %s5932_s2 = sld [smem:[#allocation37_spill]] }
  0xac   : > { %s4434_s21 = scalar_lea.hbm %s5932_s2, 16 }
  0xad   : > { %p4435_p13 = scmp.ne.s32.totalorder %s5932_s2, %s4434_s21  ;;  %p4441_p3 = scmp.lt.u32.totalorder %s4434_s21, %s5932_s2 }
  0xaf   : > { %p4437_p0 = pnand %p4435_p13, %p4876_p8 }
  0xb1   : > { %p4438_p1 = pneg %p4437_p0 }
  0xb3   : > { %p4443_p2 = pnand %p4441_p3, %p4438_p1 }
  0xb5   : > { %4446 = shalt.err (!%p4443_p2)
}
  0xb6   : > { %s4447_s25 = scalar_lea.vmem %s371_s19, 16  ;;  %s4454_s13 = scalar_lea.vmem %s371_s19, 32 }
  0xb7   : > { %p4448_p5 = scmp.ne.s32.totalorder %s371_s19, %s4447_s25  ;;  %p4455_p4 = scmp.lt.s32.totalorder %s371_s19, %s371_s19 }
  0xb8   : > { %p4456_p10 = scmp.lt.s32.totalorder %s4454_s13, %s4447_s25 }
  0xb9   : > { %p4450_p7 = pnand %p4448_p5, %p4876_p8 }
  0xba   : > { %p4457_p11 = por %p4456_p10, %p4455_p4 }
  0xbb   : > { %p4451_p9 = pneg %p4450_p7 }
  0xbd   : > { %p4458_p12 = pnand %p4457_p11, %p4451_p9 }
  0xbf   : > { %4461 = shalt.err (!%p4458_p12)
}
  0xc0   : > { %4048 = dma.hbm_to_vmem [thread:$0]  (!%p4860_p6), %s5932_s2, 16, %s371_s19, [#allocation6]  }
  0xc1   : > { %s4733_s24 = smov [#allocation10]   ;;  %s4734_s14 = smov [#allocation13]  }
  0xc2   : > { %s394_s1 = sshll.u32 %s4733_s24, 4  ;;  %s416_s23 = sshll.u32 %s4734_s14, 4  ;;  %s395_s1 = int_to_ptr.vmem [resolvable:$true] %s394_s1  ;;  %s417_s23 = int_to_ptr.vmem [resolvable:$true] %s416_s23 }
  0xc3   : > { %s4462_s17 = scalar_lea.hbm %s5897_s4, 16 }
  0xc4   : > { %p4463_p13 = scmp.ne.s32.totalorder %s5897_s4, %s4462_s17  ;;  %p4469_p3 = scmp.lt.u32.totalorder %s4462_s17, %s5897_s4 }
  0xc6   : > { %p4465_p0 = pnand %p4463_p13, %p4876_p8 }
  0xc8   : > { %p4466_p1 = pneg %p4465_p0 }
  0xca   : > { %p4471_p2 = pnand %p4469_p3, %p4466_p1 }
  0xcc   : > { %4474 = shalt.err (!%p4471_p2)
}
  0xcd   : > { %s4475_s19 = scalar_lea.vmem %s395_s1, 16  ;;  %s4482_s13 = scalar_lea.vmem %s395_s1, 32 }
  0xce   : > { %p4476_p5 = scmp.ne.s32.totalorder %s395_s1, %s4475_s19  ;;  %p4483_p4 = scmp.lt.s32.totalorder %s395_s1, %s395_s1 }
  0xcf   : > { %p4484_p10 = scmp.lt.s32.totalorder %s4482_s13, %s4475_s19 }
  0xd0   : > { %p4478_p7 = pnand %p4476_p5, %p4876_p8 }
  0xd1   : > { %p4485_p11 = por %p4484_p10, %p4483_p4 }
  0xd2   : > { %p4479_p9 = pneg %p4478_p7 }
  0xd4   : > { %p4486_p12 = pnand %p4485_p11, %p4479_p9 }
  0xd6   : > { %4489 = shalt.err (!%p4486_p12)
}
  0xd7   : > { %4054 = dma.hbm_to_vmem [thread:$0]  (!%p4860_p6), %s5897_s4, 16, %s395_s1, [#allocation9]  }
  0xd8   : > { %s4490_s29 = scalar_lea.hbm %s5899_s6, 16 }
  0xd9   : > { %p4491_p13 = scmp.ne.s32.totalorder %s5899_s6, %s4490_s29  ;;  %p4497_p3 = scmp.lt.u32.totalorder %s4490_s29, %s5899_s6 }
  0xdb   : > { %p4493_p0 = pnand %p4491_p13, %p4876_p8 }
  0xdd   : > { %p4494_p1 = pneg %p4493_p0 }
  0xdf   : > { %p4499_p2 = pnand %p4497_p3, %p4494_p1 }
  0xe1   : > { %4502 = shalt.err (!%p4499_p2)
}
  0xe2   : > { %s4503_s20 = scalar_lea.vmem %s417_s23, 16  ;;  %s4510_s1 = scalar_lea.vmem %s417_s23, 32 }
  0xe3   : > { %p4504_p5 = scmp.ne.s32.totalorder %s417_s23, %s4503_s20  ;;  %p4511_p4 = scmp.lt.s32.totalorder %s417_s23, %s417_s23 }
  0xe4   : > { %p4512_p10 = scmp.lt.s32.totalorder %s4510_s1, %s4503_s20 }
  0xe5   : > { %p4506_p7 = pnand %p4504_p5, %p4876_p8 }
  0xe6   : > { %p4513_p11 = por %p4512_p10, %p4511_p4 }
  0xe7   : > { %p4507_p9 = pneg %p4506_p7 }
  0xe9   : > { %p4514_p12 = pnand %p4513_p11, %p4507_p9 }
  0xeb   : > { %4517 = shalt.err (!%p4514_p12)
}
  0xec   : > { %4060 = dma.hbm_to_vmem [thread:$0]  (!%p4860_p6), %s5899_s6, 16, %s417_s23, [#allocation12]  }
  0xed   : > { %s4735_s13 = smov [#allocation16]   ;;  %s4736_s22 = smov [#allocation19]  }
  0xee   : > { %s438_s15 = sshll.u32 %s4735_s13, 4  ;;  %s462_s24 = sshll.u32 %s4736_s22, 4  ;;  %s439_s15 = int_to_ptr.vmem [resolvable:$true] %s438_s15  ;;  %s463_s24 = int_to_ptr.vmem [resolvable:$true] %s462_s24 }
  0xef   : > { %s4518_s21 = scalar_lea.hbm %s5901_s8, 16 }
  0xf0   : > { %p4519_p13 = scmp.ne.s32.totalorder %s5901_s8, %s4518_s21  ;;  %p4525_p3 = scmp.lt.u32.totalorder %s4518_s21, %s5901_s8 }
  0xf2   : > { %p4521_p0 = pnand %p4519_p13, %p4876_p8 }
  0xf4   : > { %p4522_p1 = pneg %p4521_p0 }
  0xf6   : > { %p4527_p2 = pnand %p4525_p3, %p4522_p1 }
  0xf8   : > { %4530 = shalt.err (!%p4527_p2)
}
  0xf9   : > { %s4531_s23 = scalar_lea.vmem %s439_s15, 16  ;;  %s4538_s1 = scalar_lea.vmem %s439_s15, 32 }
  0xfa   : > { %p4532_p5 = scmp.ne.s32.totalorder %s439_s15, %s4531_s23  ;;  %p4539_p4 = scmp.lt.s32.totalorder %s439_s15, %s439_s15 }
  0xfb   : > { %p4540_p10 = scmp.lt.s32.totalorder %s4538_s1, %s4531_s23 }
  0xfc   : > { %p4534_p7 = pnand %p4532_p5, %p4876_p8 }
  0xfd   : > { %p4541_p11 = por %p4540_p10, %p4539_p4 }
  0xfe   : > { %p4535_p9 = pneg %p4534_p7 }
 0x100   : > { %p4542_p12 = pnand %p4541_p11, %p4535_p9 }
 0x102   : > { %4545 = shalt.err (!%p4542_p12)
}
 0x103   : > { %4066 = dma.hbm_to_vmem [thread:$0]  (!%p4860_p6), %s5901_s8, 16, %s439_s15, [#allocation15]  }
 0x104   : > { %s4546_s14 = scalar_lea.hbm %s5903_s10, 16 }
 0x105   : > { %p4547_p13 = scmp.ne.s32.totalorder %s5903_s10, %s4546_s14  ;;  %p4553_p3 = scmp.lt.u32.totalorder %s4546_s14, %s5903_s10 }
 0x107   : > { %p4549_p0 = pnand %p4547_p13, %p4876_p8 }
 0x109   : > { %p4550_p1 = pneg %p4549_p0 }
 0x10b   : > { %p4555_p2 = pnand %p4553_p3, %p4550_p1 }
 0x10d   : > { %4558 = shalt.err (!%p4555_p2)
}
 0x10e   : > { %s4559_s0 = scalar_lea.vmem %s463_s24, 16  ;;  %s4566_s15 = scalar_lea.vmem %s463_s24, 32 }
 0x10f   : > { %p4560_p5 = scmp.ne.s32.totalorder %s463_s24, %s4559_s0  ;;  %p4567_p4 = scmp.lt.s32.totalorder %s463_s24, %s463_s24 }
 0x110   : > { %p4568_p10 = scmp.lt.s32.totalorder %s4566_s15, %s4559_s0 }
 0x111   : > { %p4562_p7 = pnand %p4560_p5, %p4876_p8 }
 0x112   : > { %p4569_p11 = por %p4568_p10, %p4567_p4 }
 0x113   : > { %p4563_p9 = pneg %p4562_p7 }
 0x115   : > { %p4570_p12 = pnand %p4569_p11, %p4563_p9 }
 0x117   : > { %4573 = shalt.err (!%p4570_p12)
}
 0x118   : > { %4072 = dma.hbm_to_vmem [thread:$0]  (!%p4860_p6), %s5903_s10, 16, %s463_s24, [#allocation18]  }
 0x119   : > { %s4737_s1 = smov [#allocation22]   ;;  %s4574_s22 = scalar_lea.hbm %s5905_s12, 16 }
 0x11a   : > { %s486_s25 = sshll.u32 %s4737_s1, 4  ;;  %p4575_p13 = scmp.ne.s32.totalorder %s5905_s12, %s4574_s22  ;;  %s487_s25 = int_to_ptr.vmem [resolvable:$true] %s486_s25 }
 0x11b   : > { %p4581_p3 = scmp.lt.u32.totalorder %s4574_s22, %s5905_s12 }
 0x11c   : > { %p4577_p0 = pnand %p4575_p13, %p4876_p8 }
 0x11e   : > { %p4578_p1 = pneg %p4577_p0 }
 0x120   : > { %p4583_p2 = pnand %p4581_p3, %p4578_p1 }
 0x122   : > { %4586 = shalt.err (!%p4583_p2)
}
 0x123   : > { %s4587_s24 = scalar_lea.vmem %s487_s25, 16  ;;  %s4594_s30 = scalar_lea.vmem %s487_s25, 32 }
 0x124   : > { %p4588_p5 = scmp.ne.s32.totalorder %s487_s25, %s4587_s24  ;;  %p4595_p4 = scmp.lt.s32.totalorder %s487_s25, %s487_s25 }
 0x125   : > { %p4596_p10 = scmp.lt.s32.totalorder %s4594_s30, %s4587_s24 }
 0x126   : > { %p4590_p7 = pnand %p4588_p5, %p4876_p8 }
 0x127   : > { %p4597_p11 = por %p4596_p10, %p4595_p4 }
 0x128   : > { %p4591_p9 = pneg %p4590_p7 }
 0x12a   : > { %p4598_p12 = pnand %p4597_p11, %p4591_p9 }
 0x12c   : > { %4601 = shalt.err (!%p4598_p12)
}
 0x12d   : > { %s5933_s16 = sld [smem:[#allocation32_spill]]  ;;  %s5934_s20 = sld [smem:[#allocation33_spill]] }
 0x12e   : > { %4078 = dma.hbm_to_vmem [thread:$0]  (!%p4860_p6), %s5905_s12, 16, %s487_s25, [#allocation21]  }
 0x12f   : > { %s3726_s23 = sadd.s32 4294967294, %s4722_s28   ;;  %s5120_s18 = sadd.s32 1, %s4722_s28  }
 0x130   : > { %s39_s1 = ssub.s32 %s4722_s28, %s5120_s18  ;;  %s42_s19 = sadd.s32 1, %s4718_s27 }
 0x131   : > { %p40_p8 = scmp.eq.s32.totalorder %s39_s1, 0  ;;  %p49_p13 = scmp.ne.s32.totalorder %s4718_s27, %s4714_s26 }
 0x132   : > { %p50_p0 = scmp.eq.s32.totalorder %s4722_s28, 0  ;;  %p337_p7 = scmp.eq.s32.totalorder %s3726_s23, 1 }
 0x133   : > { %p55_p1 = scmp.ne.s32.totalorder %s4714_s26, %s5933_s16  ;;  %p5935_p2 = scmp.eq.s32.totalorder %s5934_s20, 0 }
 0x134   : > { %s5131_s13 = scalar_select %p40_p8, %s4718_s27, %s42_s19  }
 0x135   : > { %p51_p3 = por %p50_p0, %p49_p13  ;;  %p5135_p5 = por %p5935_p2, %p55_p1 }
 0x136   : > { %p331_p6 = scmp.eq.s32.totalorder %s5934_s20, 1  ;;  %p4099_p9 = scmp.lt.s32.totalorder %s4722_s28, 2 }
 0x137   : > { %s497_s25 = sand.u32 1, %s4718_s27   ;;  %p5146_p10 = por %p337_p7, %p55_p1 }
 0x138   : > { %p5142_p4 = por %p331_p6, %p49_p13  ;;  %s3986_s21 = smul.u32 24, %s497_s25 }
 0x139   : > { %s5938_s29 = scalar_select %p5146_p10, 1, 0 }
 0x13a   : > { %s5937_s14 = scalar_select %p5142_p4, 1, 0 }
 0x13b   : > { %s3987_s17 = smul.u32 384, %s4722_s28  ;;  %p5151_p11 = pnand %p4099_p9, %p51_p3 }
 0x13c   : > { %s5940_s15 = sld [smem:[#allocation35_spill]]  ;;  %s501_s20 = scalar_lea.vmem [#allocation2], %s3986_s21 }
 0x13d   : > { %s508_s23 = sshll.u32 %s501_s20, 4  ;;  %s5162_s1 = scalar_lea.sflag [#allocation3], %s497_s25  ;;  %s5160_s23 = int_to_ptr.vmem [resolvable:$true] %s508_s23 }
 0x13e   : > { %p4604_p8 = pneg %p5151_p11 }
 0x142   : > { %s5158_s16 = scalar_lea.hbm %s5940_s15, %s3987_s17  ;;  %s4607_s0 = scalar_lea.hbm %s5940_s15, 768 }
 0x143   : > { %s4602_s19 = scalar_lea.hbm %s5158_s16, 384  ;;  %p4608_p1 = scmp.lt.u32.totalorder %s5158_s16, %s5940_s15 }
 0x144   : > { %p4603_p12 = scmp.ne.s32.totalorder %s5158_s16, %s4602_s19  ;;  %p4609_p3 = scmp.lt.u32.totalorder %s4607_s0, %s4602_s19 }
 0x145   : > { %p4611_p6 = scmp.lt.u32.totalorder %s4602_s19, %s5158_s16 }
 0x146   : > { %p4605_p13 = pnand %p4604_p8, %p4603_p12  ;;  %p4610_p2 = por %p4609_p3, %p4608_p1 }
 0x148   : > { %p4606_p0 = pneg %p4605_p13  ;;  %p4612_p7 = por %p4611_p6, %p4610_p2 }
 0x14a   : > { %p4613_p9 = pnand %p4612_p7, %p4606_p0 }
 0x14c   : > { %4616 = shalt.err (!%p4613_p9)
}
 0x14d   : > { %s4617_s25 = scalar_lea.vmem %s5160_s23, 384  ;;  %s4738_s21 = smov [#allocation2]  }
 0x14e   : > { %p4618_p12 = scmp.ne.s32.totalorder %s5160_s23, %s4617_s25  ;;  %s4622_s20 = sshll.u32 %s4738_s21, 4  ;;  %s4623_s20 = int_to_ptr.vmem [resolvable:$false] %s4622_s20 }
 0x14f   : > { %s4624_s2 = scalar_lea.vmem %s4623_s20, 768  ;;  %p4625_p4 = scmp.lt.s32.totalorder %s5160_s23, %s4623_s20 }
 0x150   : > { %p4620_p13 = pnand %p4618_p12, %p4604_p8  ;;  %p4626_p1 = scmp.lt.s32.totalorder %s4624_s2, %s4617_s25 }
 0x152   : > { %p4621_p10 = pneg %p4620_p13  ;;  %p4627_p3 = por %p4626_p1, %p4625_p4 }
 0x154   : > { %p4628_p2 = pnand %p4627_p3, %p4621_p10 }
 0x156   : > { %4631 = shalt.err (!%p4628_p2)
}
 0x157   : > { %s4739_s3 = smov 128   ;;  %s4740_s19 = smov 8  }
 0x158   : > { %4082 = dma.hbm_to_vmem [thread:$0]  (!%p5151_p11), %s5158_s16, 384, %s5160_s23, %s5162_s1, %s4739_s3, %s4739_s3, %s4740_s19  }
 0x159   : > { %s5941_s17 = sld [smem:[#allocation34_spill]] }
 0x15f   : > { %p5942_p8 = scmp.ne.s32.totalorder %s5941_s17, 0 }
 0x160   : > { %s5193_s30 = sand.u32 (!%p5942_p8), 1, %s4714_s26  }
 0x161   : > { %520 = sbr.rel (%p5942_p8) target bundleno = 3192 (0xc78), region = 72  ;;  %s523_s25 = scalar_lea.sflag (!%p5942_p8), [#allocation3], %s5193_s30 }
 0x162   : > { %s3988_s0 = smul.u32 (!%p5942_p8), 24, %s5193_s30 }
 0x164   : > { %s5199_s21 = scalar_lea.vmem (!%p5942_p8), [#allocation2], %s3988_s0 }
 0x168   : > { %4677 = dma.done.wait (%p5135_p5), %s523_s25, 384  }
 0x169   : > { %4679 = vsyncadd (%p5135_p5), %s523_s25, 4294966912  ;;  %s5943_s24 = sld [smem:[#allocation33_spill]] }
 0x16f   : > { %p5944_p4 = scmp.eq.s32.totalorder %s5943_s24, 0 }
 0x171   : > { %4681 = dma.done.wait (%p5944_p4), [#allocation6], 272   ;;  %p5945_p10 = pmov %p5944_p4 }
 0x172   : > { %p5946_p11 = pmov %p5944_p4 }
 0x173   : > { %4683 = vsyncadd (%p5945_p10), [#allocation6], 4294967024 }
 0x174   : > { %4685 = dma.done.wait (%p5946_p11), [#allocation9], 272   ;;  %p5947_p0 = pmov %p5944_p4 }
 0x176   : > { %4687 = vsyncadd (%p5947_p0), [#allocation9], 4294967024  ;;  %p5948_p6 = pmov %p5947_p0 }
 0x177   : > { %p5949_p7 = pmov %p5947_p0 }
 0x178   : > { %4689 = dma.done.wait (%p5948_p6), [#allocation12], 32  }
 0x179   : > { %4691 = vsyncadd (%p5949_p7), [#allocation12], 4294967264  ;;  %p5950_p5 = pmov %p5947_p0 }
 0x17a   : > { %p5951_p9 = pmov %p5947_p0 }
 0x17b   : > { %4693 = dma.done.wait (%p5950_p5), [#allocation15], 32  }
 0x17c   : > { %4695 = vsyncadd (%p5951_p9), [#allocation15], 4294967264  ;;  %p5952_p12 = pmov %p5947_p0 }
 0x17d   : > { %p5953_p13 = pmov %p5947_p0 }
 0x17e   : > { %4697 = dma.done.wait (%p5952_p12), [#allocation18], 272  }
 0x17f   : > { %4699 = vsyncadd (%p5953_p13), [#allocation18], 4294967024  ;;  %p5954_p1 = pmov %p5947_p0 }
 0x180   : > { %p5955_p3 = pmov %p5947_p0 }
 0x181   : > { %4701 = dma.done.wait (%p5954_p1), [#allocation21], 528  }
 0x182   : > { %4703 = vsyncadd (%p5955_p3), [#allocation21], 4294966768  ;;  %vm623_vm0 = vcmask 261120   ;;  %v618_v0 = vld [vmem:[%s5199_s21] sm:$0xff]  ;;  %v620_v1 = vld [vmem:[%s5199_s21 + $0x10] sm:$0xff]  ;;  %s4741_s22 = smov 112   ;;  %v796_v58 = vlaneseq }
 0x183   : > { %v619_v2 = vld [vmem:[%s5199_s21 + $0x8] sm:$0xff]  ;;  %v624_v3 = vsel %vm623_vm0, %v618_v0, 0.0  ;;  %v630_v4 = vsel %vm623_vm0, %v620_v1, 0.0  ;;  %v4187_v21 = vld [vmem:[#allocation5] sm:$0xff]   ;;  %v4188_v22 = vld [vmem:[#allocation5 + $0x8] sm:$0xff]   ;;  %s4742_s16 = smov 120  }
 0x184   : > { %v627_v5 = vsel %vm623_vm0, %v619_v2, 0.0  ;;  %625 = vadd.xlane.f32.xlu0 %v624_v3  ;;  %631 = vadd.xlane.f32.xlu1 %v630_v4  ;;  %v3755_v34 = vld [vmem:[#allocation11] ss:$0 sm:$0xff]  ;;  %v3756_v40 = vld [vmem:[#allocation13] ss:$0 sm:$0xff]  ;;  %s4743_s23 = smov 104  }
 0x185   : > { %3874 = vmatprep.subr.bf16.mxu0 %v4187_v21  ;;  %v3757_v48 = vld [vmem:[#allocation7] ss:$0 sm:$0xff]  ;;  %s4744_s1 = smov 96   ;;  %v4745_v56 = vmov 1983009808   ;;  %v797_v62 = vshrl.u32 %v796_v58, 7 }
 0x186   : > { %3875 = vmatpush3.bf16.msra.mxu0 %v4187_v21  ;;  %v794_v57 = vunpack.c.l.s4 %v4745_v56  ;;  %v4746_v59 = vmov 1934713408   ;;  %s4747_s20 = smov 64   ;;  %vm2111_vm1 = vcmask 64512   ;;  %vm2364_vm2 = vcmask 195584   ;;  %s4748_s2 = smov 16  }
 0x187   : > { %3876 = vmatprep.subr.bf16.mxu0 %v4188_v22  ;;  %v826_v60 = vunpack.c.l.s4 %v4746_v59  ;;  %vm2511_vm3 = vcmask 1043456   ;;  %s4749_s3 = smov 8   ;;  %s4750_s19 = smov 24   ;;  %vm3181_vm4 = vcmask 130048   ;;  %vm3464_vm5 = vcmask 523264  }
 0x188   : > { %628 = vadd.xlane.f32.xlu0 %v627_v5  ;;  %v795_v61 = vunpack.c.0.s8 %v794_v57  ;;  %s616_s17 = scalar_lea.vmem [#allocation23], %s3988_s0  ;;  %p5957_p8 = scmp.ne.s32.totalorder %s5937_s14, 0 }
 0x189   : > { %s3539_s25 = sshll.u32 %s616_s17, 4  ;;  %s5840_s25 = int_to_ptr.vmem [resolvable:$true] %s3539_s25 }
 0x18a   : > { %3877 = vmatpush3.bf16.msra.mxu0 %v4188_v22 }
 0x211   : > { %v626_v6 = vpop.xlane.xlu0 %625  ;;  %v632_v7 = vpop.xlane.xlu1 %631 }
 0x212   : > { %v634_v8 = vmul.f32 0.03125, %v626_v6  ;;  %v636_v9 = vmul.f32 0.03125, %v632_v7 }
 0x214   : > { %v637_v10 = vsub.f32 %v618_v0, %v634_v8  ;;  %v639_v11 = vsub.f32 %v620_v1, %v636_v9  ;;  %v827_v1 = vunpack.c.0.s8 %v826_v60 }
 0x215   : > { %v629_v12 = vpop.xlane.xlu0 %628 }
 0x216   : > { %v635_v13 = vmul.f32 0.03125, %v629_v12  ;;  %v640_v14 = vmul.f32 %v637_v10, %v637_v10  ;;  %v642_v15 = vmul.f32 %v639_v11, %v639_v11  ;;  %v5283_v9 = vsub.s32 %v827_v1, %v797_v62 }
 0x218   : > { %v638_v16 = vsub.f32 %v619_v2, %v635_v13  ;;  %v643_v17 = vsel %vm623_vm0, %v640_v14, 0.0  ;;  %v649_v18 = vsel %vm623_vm0, %v642_v15, 0.0  ;;  %v5265_v2 = vsub.s32 %v795_v61, %v797_v62 }
 0x219   : > { %644 = vadd.xlane.f32.xlu1 %v643_v17 }
 0x21a   : > { %v641_v19 = vmul.f32 %v638_v16, %v638_v16 }
 0x21c   : > { %v646_v20 = vsel %vm623_vm0, %v641_v19, 0.0 }
 0x21d   : > { %650 = vadd.xlane.f32.xlu1 %v649_v18  ;;  %647 = vadd.xlane.f32.xlu0 %v646_v20 }
 0x2a6   : > { %v645_v23 = vpop.xlane.xlu1 %644 }
 0x2a7   : > { %v652_v24 = vmul.f32 0.03125, %v645_v23 }
 0x2a9   : > { %v655_v25 = vadd.f32 1e-05, %v652_v24 }
 0x2aa   : > { %v651_v26 = vpop.xlane.xlu1 %650  ;;  %v648_v27 = vpop.xlane.xlu0 %647 }
 0x2ab   : > { %4197 = vrsqrt.f32 %v655_v25  ;;  %v654_v28 = vmul.f32 0.03125, %v651_v26  ;;  %v653_v29 = vmul.f32 0.03125, %v648_v27 }
 0x2ad   : > { %v657_v30 = vadd.f32 1e-05, %v654_v28  ;;  %v656_v31 = vadd.f32 1e-05, %v653_v29 }
 0x2af   : > { %4199 = vrsqrt.f32 %v657_v30 }
 0x2b0   : > { %4201 = vrsqrt.f32 %v656_v31 }
 0x2b5   : > { %v4198_v32 = vpop.eup %4197 }
 0x2b6   : > { %v661_v33 = vmul.f32 %v4198_v32, %v637_v10 }
 0x2b8   : > { %v670_v39 = vmul.f32 %v3755_v34, %v661_v33 }
 0x2b9   : > { %v4200_v35 = vpop.eup %4199 }
 0x2ba   : > { %v4202_v36 = vpop.eup %4201  ;;  %v663_v37 = vmul.f32 %v4200_v35, %v639_v11  ;;  %v679_v44 = vadd.f32 %v3756_v40, %v670_v39 }
 0x2bb   : > { %v662_v38 = vmul.f32 %v4202_v36, %v638_v16 }
 0x2bc   : > { %v672_v41 = vmul.f32 %v3755_v34, %v663_v37 }
 0x2bd   : > { %v671_v42 = vmul.f32 %v3755_v34, %v662_v38 }
 0x2be   : > { %v681_v43 = vadd.f32 %v3756_v40, %v672_v41 }
 0x2bf   : > { %v680_v45 = vadd.f32 %v3756_v40, %v671_v42 }
 0x2c0   : > { %v683_v46 = vpack.c.bf16 %v681_v43, %v681_v43 }
 0x2c1   : > { %v682_v47 = vpack.c.bf16 %v680_v45, %v679_v44 }
 0x2c3   : > { %3878 = vmatprep.mubr.msk.bf16.mxu0 %vm623_vm0, %v682_v47 }
 0x2c4   : > { %3879 = vmatmul.mubr.msk.bf16.vlgmr.msra.gmra.mrb[0].mxu0 %vm623_vm0, %v683_v46 }
 0x397   : > { %v3880_v49 = vpop.f32.mrb[0].mxu0 }
 0x398   : > { %v747_v50 = vpop.f32.mrb[1].mxu0  ;;  %v5248_v55 = vadd.f32 %v3880_v49, %v3757_v48 }
 0x399   : > { %v5240_v51 = vadd.f32 %v3757_v48, %v747_v50  ;;  %v3881_v52 = vpop.f32.mrb[2].mxu0 }
 0x39a   : > { %v750_v53 = vpop.f32.mrb[3].mxu0 }
 0x39b   : > { %773 = vrot.lane.b32.xlu1 %v5240_v51, %s4741_s22  ;;  %764 = vrot.lane.b32.xlu0 %v5240_v51, %s4742_s16  ;;  %v5244_v54 = vadd.f32 %v3757_v48, %v750_v53 }
 0x39f   : > { %766 = vrot.lane.b32.xlu1 %v5244_v54, %s4742_s16  ;;  %782 = vrot.lane.b32.xlu0 %v5240_v51, %s4743_s23 }
 0x3a3   : > { %775 = vrot.lane.b32.xlu1 %v5244_v54, %s4741_s22  ;;  %768 = vrot.lane.b32.xlu0 %v5248_v55, %s4742_s16 }
 0x3a7   : > { %784 = vrot.lane.b32.xlu1 %v5244_v54, %s4743_s23  ;;  %786 = vrot.lane.b32.xlu0 %v5248_v55, %s4743_s23  ;;  %s3526_s23 = scalar_lea.sflag [#allocation4], %s5193_s30 }
 0x3ab   : > { %777 = vrot.lane.b32.xlu1 %v5248_v55, %s4741_s22  ;;  %1209 = vrot.lane.b32.xlu0 %v5244_v54, %s4744_s1 }
 0x3af   : > { %1207 = vrot.lane.b32.xlu1 %v5240_v51, %s4744_s1 }
 0x40d   : > { %v5259_v63 = vpop.permute.xlu1 %773  ;;  %v5261_v0 = vpop.permute.xlu0 %764 }
 0x40e   : > { %1213 = vrot.lane.b32.xlu1 %v5261_v0, %s4744_s1  ;;  %v791_v3 = vcombine.low %v5240_v51, %v5259_v63  ;;  %v792_v4 = vcombine.high %v5240_v51, %v5259_v63 }
 0x410   : > { %v799_v10 = vrot.slane %v791_v3, %v5265_v2  ;;  %v806_v11 = vrot.slane %v792_v4, %v5265_v2 }
 0x411   : > { %v5271_v5 = vpop.permute.xlu1 %766  ;;  %v5273_v6 = vpop.permute.xlu0 %782 }
 0x412   : > { %v807_v7 = vcombine.low %v5261_v0, %v5273_v6  ;;  %v808_v8 = vcombine.high %v5261_v0, %v5273_v6  ;;  %1215 = vrot.lane.b32.xlu0 %v5271_v5, %s4744_s1  ;;  %1219 = vrot.lane.b32.xlu1 %v5259_v63, %s4744_s1 }
 0x414   : > { %v815_v12 = vrot.slane %v807_v7, %v5265_v2  ;;  %v822_v13 = vrot.slane %v808_v8, %v5265_v2 }
 0x415   : > { %v5289_v14 = vpop.permute.xlu1 %775  ;;  %v5311_v28 = vpop.permute.xlu0 %768 }
 0x416   : > { %v823_v15 = vcombine.low %v799_v10, %v815_v12  ;;  %v824_v16 = vcombine.high %v799_v10, %v815_v12  ;;  %v839_v17 = vcombine.low %v806_v11, %v822_v13  ;;  %v840_v18 = vcombine.high %v806_v11, %v822_v13  ;;  %1221 = vrot.lane.b32.xlu0 %v5289_v14, %s4744_s1 }
 0x417   : > { %v859_v19 = vcombine.low %v5244_v54, %v5289_v14  ;;  %v860_v20 = vcombine.high %v5244_v54, %v5289_v14  ;;  %1225 = vrot.lane.b32.xlu1 %v5273_v6, %s4744_s1 }
 0x418   : > { %v831_v21 = vrot.slane %v823_v15, %v5283_v9  ;;  %v838_v22 = vrot.slane %v824_v16, %v5283_v9  ;;  %v847_v23 = vrot.slane %v839_v17, %v5283_v9  ;;  %v854_v24 = vrot.slane %v840_v18, %v5283_v9 }
 0x419   : > { %v5303_v25 = vpop.permute.xlu1 %784  ;;  %v867_v33 = vrot.slane %v859_v19, %v5265_v2  ;;  %v874_v34 = vrot.slane %v860_v20, %v5265_v2  ;;  %v5333_v52 = vpop.permute.xlu0 %786 }
 0x41a   : > { %v875_v26 = vcombine.low %v5271_v5, %v5303_v25  ;;  %v876_v27 = vcombine.high %v5271_v5, %v5303_v25  ;;  %1227 = vrot.lane.b32.xlu0 %v5303_v25, %s4744_s1  ;;  %v995_v29 = vcombine.low %v831_v21, %v838_v22  ;;  %v3762_v30 = vcombine.high %v831_v21, %v838_v22 }
 0x41b   : > { %1211 = vrot.lane.b32.xlu1 %v5248_v55, %s4744_s1  ;;  %v1011_v31 = vcombine.low %v847_v23, %v854_v24  ;;  %v3763_v32 = vcombine.high %v847_v23, %v854_v24 }
 0x41c   : > { %v883_v35 = vrot.slane %v875_v26, %v5265_v2  ;;  %v890_v36 = vrot.slane %v876_v27, %v5265_v2  ;;  %v1002_v38 = vrot.slane %v995_v29, %v5265_v2  ;;  %v1010_v39 = vrot.slane %v3762_v30, %v5265_v2 }
 0x41d   : > { %v5319_v37 = vpop.permute.xlu1 %777  ;;  %v1018_v40 = vrot.slane %v1011_v31, %v5265_v2  ;;  %v1026_v41 = vrot.slane %v3763_v32, %v5265_v2  ;;  %v944_v31 = vcombine.high %v5311_v28, %v5333_v52 }
 0x41e   : > { %v891_v42 = vcombine.low %v867_v33, %v883_v35  ;;  %v892_v43 = vcombine.high %v867_v33, %v883_v35  ;;  %v907_v44 = vcombine.low %v874_v34, %v890_v36  ;;  %v908_v45 = vcombine.high %v874_v34, %v890_v36  ;;  %1217 = vrot.lane.b32.xlu0 %v5311_v28, %s4744_s1 }
 0x41f   : > { %1223 = vrot.lane.b32.xlu1 %v5319_v37, %s4744_s1  ;;  %v1028_v46 = vcombine.high %v1002_v38, %v1010_v39  ;;  %v1044_v53 = vcombine.high %v1018_v40, %v1026_v41  ;;  %v1027_v61 = vcombine.low %v1002_v38, %v1010_v39  ;;  %v1043_v62 = vcombine.low %v1018_v40, %v1026_v41 }
 0x420   : > { %v899_v47 = vrot.slane %v891_v42, %v5283_v9  ;;  %v906_v48 = vrot.slane %v892_v43, %v5283_v9  ;;  %v915_v49 = vrot.slane %v907_v44, %v5283_v9  ;;  %v922_v50 = vrot.slane %v908_v45, %v5283_v9 }
 0x421   : > { %v1035_v10 = vrot.slane %v1027_v61, %v5283_v9  ;;  %v1051_v11 = vrot.slane %v1043_v62, %v5283_v9  ;;  %v1058_v15 = vrot.slane %v1044_v53, %v5283_v9  ;;  %v928_v30 = vcombine.high %v5248_v55, %v5319_v37  ;;  %v1208_v44 = vpop.permute.xlu1 %1207 }
 0x422   : > { %1229 = vrot.lane.b32.xlu0 %v5333_v52, %s4744_s1  ;;  %v1063_v56 = vcombine.low %v899_v47, %v906_v48  ;;  %v3764_v57 = vcombine.high %v899_v47, %v906_v48  ;;  %v1079_v58 = vcombine.low %v915_v49, %v922_v50  ;;  %v3765_v3 = vcombine.high %v915_v49, %v922_v50  ;;  %v1210_v49 = vpop.permute.xlu0 %1209  ;;  %s4632_s1 = scalar_lea.vmem %s5840_s25, 384 }
 0x423   : > { %1659 = vrot.lane.b32.xlu1 %v5240_v51, %s4747_s20  ;;  %v1042_v51 = vrot.slane %v1028_v46, %v5283_v9  ;;  %v1059_v20 = vcombine.low %v1035_v10, %v1051_v11  ;;  %v1060_v21 = vcombine.high %v1035_v10, %v1051_v11  ;;  %v942_v33 = vrot.slane %v928_v30, %v5265_v2  ;;  %p4633_p2 = scmp.ne.s32.totalorder %s5840_s25, %s4632_s1 }
 0x424   : > { %v1070_v59 = vrot.slane %v1063_v56, %v5265_v2  ;;  %v1078_v60 = vrot.slane %v3764_v57, %v5265_v2  ;;  %v1086_v1 = vrot.slane %v1079_v58, %v5265_v2  ;;  %v1094_v7 = vrot.slane %v3765_v3, %v5265_v2 }
 0x425   : > { %v1061_v17 = vcombine.low %v1042_v51, %v1058_v15  ;;  %v1062_v19 = vcombine.high %v1042_v51, %v1058_v15  ;;  %p4634_p4 = pnand %p4633_p2, %p5957_p8 }
 0x426   : > { %1661 = vrot.lane.b32.xlu0 %v5244_v54, %s4747_s20  ;;  %v1095_v4 = vcombine.low %v1070_v59, %v1078_v60  ;;  %v1096_v8 = vcombine.high %v1070_v59, %v1078_v60  ;;  %v1111_v54 = vcombine.low %v1086_v1, %v1094_v7  ;;  %v1112_v13 = vcombine.high %v1086_v1, %v1094_v7 }
 0x427   : > { %1665 = vrot.lane.b32.xlu1 %v5261_v0, %s4747_s20  ;;  %p4635_p10 = pneg %p4634_p4 }
 0x428   : > { %v1103_v12 = vrot.slane %v1095_v4, %v5283_v9  ;;  %v1110_v0 = vrot.slane %v1096_v8, %v5283_v9  ;;  %v1119_v16 = vrot.slane %v1111_v54, %v5283_v9  ;;  %v1126_v18 = vrot.slane %v1112_v13, %v5283_v9 }
 0x42a   : > { %1673 = vrot.lane.b32.xlu0 %v5289_v14, %s4747_s20  ;;  %v1127_v22 = vcombine.low %v1103_v12, %v1119_v16  ;;  %v1128_v23 = vcombine.high %v1103_v12, %v1119_v16  ;;  %v1129_v14 = vcombine.low %v1110_v0, %v1126_v18  ;;  %v1130_v24 = vcombine.high %v1110_v0, %v1126_v18 }
 0x42b   : > { %1671 = vrot.lane.b32.xlu1 %v5259_v63, %s4747_s20 }
 0x42c   : > { %v1199_v63 = vpack.c.bf16 %v1127_v22, %v1059_v20  ;;  %v1201_v26 = vpack.c.bf16 %v1128_v23, %v1060_v21  ;;  %v5363_v27 = vpack.c.bf16 %v1129_v14, %v1061_v17  ;;  %v5365_v29 = vpack.c.bf16 %v1130_v24, %v1062_v19 }
 0x42e   : > { %1679 = vrot.lane.b32.xlu0 %v5303_v25, %s4747_s20  ;;  %3886 = vmatprep.mubr.msk.bf16.mxu1 %vm2111_vm1, %v1199_v63  ;;  %v927_v25 = vcombine.low %v5248_v55, %v5319_v37 }
 0x42f   : > { %1677 = vrot.lane.b32.xlu1 %v5273_v6, %s4747_s20  ;;  %3894 = vmatprep.mubr.msk.bf16.mxu0 %vm2111_vm1, %v1201_v26  ;;  %v943_v6 = vcombine.low %v5311_v28, %v5333_v52 }
 0x430   : > { %v935_v32 = vrot.slane %v927_v25, %v5265_v2 }
 0x431   : > { %v951_v34 = vrot.slane %v943_v6, %v5265_v2 }
 0x433   : > { %1667 = vrot.lane.b32.xlu1 %v5271_v5, %s4747_s20  ;;  %v958_v5 = vrot.slane %v944_v31, %v5265_v2  ;;  %v959_v35 = vcombine.low %v935_v32, %v951_v34  ;;  %v960_v36 = vcombine.high %v935_v32, %v951_v34 }
 0x435   : > { %v975_v38 = vcombine.low %v942_v33, %v958_v5  ;;  %v976_v39 = vcombine.high %v942_v33, %v958_v5  ;;  %v967_v40 = vrot.slane %v959_v35, %v5283_v9  ;;  %v974_v41 = vrot.slane %v960_v36, %v5283_v9 }
 0x437   : > { %v983_v42 = vrot.slane %v975_v38, %v5283_v9  ;;  %v990_v43 = vrot.slane %v976_v39, %v5283_v9  ;;  %v1131_v45 = vcombine.low %v967_v40, %v974_v41  ;;  %v3766_v46 = vcombine.high %v967_v40, %v974_v41 }
 0x439   : > { %v1147_v47 = vcombine.low %v983_v42, %v990_v43  ;;  %v3767_v48 = vcombine.high %v983_v42, %v990_v43  ;;  %v5388_v53 = vrot.slane %v1131_v45, %v5265_v2  ;;  %v5391_v56 = vrot.slane %v3766_v46, %v5265_v2 }
 0x43b   : > { %v5394_v57 = vrot.slane %v1147_v47, %v5265_v2  ;;  %v5397_v58 = vrot.slane %v3767_v48, %v5265_v2  ;;  %v1163_v61 = vcombine.low %v5388_v53, %v5391_v56 }
 0x43d   : > { %v1179_v62 = vcombine.low %v5394_v57, %v5397_v58  ;;  %v5404_v8 = vrot.slane %v1163_v61, %v5283_v9 }
 0x43f   : > { %v5407_v51 = vrot.slane %v1179_v62, %v5283_v9 }
 0x441   : > { %v5415_v21 = vcombine.low %v5404_v8, %v5407_v51 }
 0x480   : > { %v1214_v50 = vpop.permute.xlu1 %1213 }
 0x484   : > { %v1220_v59 = vpop.permute.xlu1 %1219  ;;  %v1216_v60 = vpop.permute.xlu0 %1215 }
 0x485   : > { %v1243_v1 = vcombine.low %v1208_v44, %v1220_v59  ;;  %v1244_v3 = vcombine.high %v1208_v44, %v1220_v59 }
 0x487   : > { %v1251_v13 = vrot.slane %v1243_v1, %v5265_v2  ;;  %v1258_v15 = vrot.slane %v1244_v3, %v5265_v2 }
 0x488   : > { %v1222_v4 = vpop.permute.xlu0 %1221 }
 0x489   : > { %v1226_v7 = vpop.permute.xlu1 %1225  ;;  %v1311_v12 = vcombine.low %v1210_v49, %v1222_v4  ;;  %v1312_v54 = vcombine.high %v1210_v49, %v1222_v4 }
 0x48a   : > { %v1259_v10 = vcombine.low %v1214_v50, %v1226_v7  ;;  %v1260_v11 = vcombine.high %v1214_v50, %v1226_v7 }
 0x48b   : > { %v1319_v63 = vrot.slane %v1311_v12, %v5265_v2  ;;  %v1326_v26 = vrot.slane %v1312_v54, %v5265_v2 }
 0x48c   : > { %v1267_v0 = vrot.slane %v1259_v10, %v5265_v2  ;;  %v1274_v16 = vrot.slane %v1260_v11, %v5265_v2  ;;  %v1228_v17 = vpop.permute.xlu0 %1227 }
 0x48d   : > { %v1212_v18 = vpop.permute.xlu1 %1211  ;;  %v1327_v19 = vcombine.low %v1216_v60, %v1228_v17  ;;  %v1328_v20 = vcombine.high %v1216_v60, %v1228_v17 }
 0x48e   : > { %v1275_v22 = vcombine.low %v1251_v13, %v1267_v0  ;;  %v1276_v23 = vcombine.high %v1251_v13, %v1267_v0  ;;  %v1291_v14 = vcombine.low %v1258_v15, %v1274_v16  ;;  %v1292_v24 = vcombine.high %v1258_v15, %v1274_v16 }
 0x48f   : > { %v1335_v25 = vrot.slane %v1327_v19, %v5265_v2  ;;  %v1342_v30 = vrot.slane %v1328_v20, %v5265_v2 }
 0x490   : > { %v1283_v6 = vrot.slane %v1275_v22, %v5283_v9  ;;  %v1290_v31 = vrot.slane %v1276_v23, %v5283_v9  ;;  %v1299_v32 = vrot.slane %v1291_v14, %v5283_v9  ;;  %v1306_v33 = vrot.slane %v1292_v24, %v5283_v9  ;;  %v1218_v34 = vpop.permute.xlu0 %1217 }
 0x491   : > { %v1343_v5 = vcombine.low %v1319_v63, %v1335_v25  ;;  %v1344_v35 = vcombine.high %v1319_v63, %v1335_v25  ;;  %v1359_v36 = vcombine.low %v1326_v26, %v1342_v30  ;;  %v1360_v38 = vcombine.high %v1326_v26, %v1342_v30  ;;  %v1224_v39 = vpop.permute.xlu1 %1223 }
 0x492   : > { %v1447_v40 = vcombine.low %v1283_v6, %v1290_v31  ;;  %v3768_v41 = vcombine.high %v1283_v6, %v1290_v31  ;;  %v1463_v42 = vcombine.low %v1299_v32, %v1306_v33  ;;  %v3769_v43 = vcombine.high %v1299_v32, %v1306_v33 }
 0x493   : > { %v1351_v44 = vrot.slane %v1343_v5, %v5283_v9  ;;  %v1358_v45 = vrot.slane %v1344_v35, %v5283_v9  ;;  %v1367_v46 = vrot.slane %v1359_v36, %v5283_v9  ;;  %v1374_v47 = vrot.slane %v1360_v38, %v5283_v9 }
 0x494   : > { %v1379_v48 = vcombine.low %v1212_v18, %v1224_v39  ;;  %v1380_v49 = vcombine.high %v1212_v18, %v1224_v39  ;;  %v1230_v50 = vpop.permute.xlu0 %1229  ;;  %v5430_v59 = vrot.slane %v1447_v40, %v5265_v2  ;;  %v5433_v60 = vrot.slane %v3768_v41, %v5265_v2 }
 0x495   : > { %v1515_v61 = vcombine.low %v1351_v44, %v1358_v45  ;;  %v3770_v62 = vcombine.high %v1351_v44, %v1358_v45  ;;  %v1531_v1 = vcombine.low %v1367_v46, %v1374_v47  ;;  %v3771_v3 = vcombine.high %v1367_v46, %v1374_v47  ;;  %v1660_v4 = vpop.permute.xlu1 %1659 }
 0x496   : > { %v1387_v7 = vrot.slane %v1379_v48, %v5265_v2  ;;  %v1394_v10 = vrot.slane %v1380_v49, %v5265_v2  ;;  %v1395_v11 = vcombine.low %v1218_v34, %v1230_v50  ;;  %v1396_v12 = vcombine.high %v1218_v34, %v1230_v50 }
 0x497   : > { %v1470_v54 = vrot.slane %v1463_v42, %v5265_v2  ;;  %v1478_v13 = vrot.slane %v3769_v43, %v5265_v2  ;;  %v1479_v15 = vcombine.low %v5430_v59, %v5433_v60  ;;  %v1480_v0 = vcombine.high %v5430_v59, %v5433_v60 }
 0x498   : > { %v1403_v16 = vrot.slane %v1395_v11, %v5265_v2  ;;  %v1410_v17 = vrot.slane %v1396_v12, %v5265_v2  ;;  %v1662_v18 = vpop.permute.xlu0 %1661  ;;  %v1522_v19 = vrot.slane %v1515_v61, %v5265_v2  ;;  %v1530_v20 = vrot.slane %v3770_v62, %v5265_v2 }
 0x499   : > { %v1666_v22 = vpop.permute.xlu1 %1665  ;;  %v5448_v23 = vrot.slane %v1479_v15, %v5283_v9  ;;  %v1495_v14 = vcombine.low %v1470_v54, %v1478_v13  ;;  %v1496_v24 = vcombine.high %v1470_v54, %v1478_v13  ;;  %v5451_v63 = vrot.slane %v1531_v1, %v5265_v2 }
 0x49a   : > { %v1411_v26 = vcombine.low %v1387_v7, %v1403_v16  ;;  %v1412_v25 = vcombine.high %v1387_v7, %v1403_v16  ;;  %v1427_v30 = vcombine.low %v1394_v10, %v1410_v17  ;;  %v1428_v6 = vcombine.high %v1394_v10, %v1410_v17 }
 0x49b   : > { %v1503_v31 = vrot.slane %v1495_v14, %v5283_v9  ;;  %v5455_v32 = vrot.slane %v3771_v3, %v5265_v2  ;;  %v1547_v33 = vcombine.low %v1522_v19, %v1530_v20  ;;  %v1548_v34 = vcombine.high %v1522_v19, %v1530_v20 }
 0x49c   : > { %v1419_v5 = vrot.slane %v1411_v26, %v5283_v9  ;;  %v1426_v35 = vrot.slane %v1412_v25, %v5283_v9  ;;  %v1435_v36 = vrot.slane %v1427_v30, %v5283_v9  ;;  %v1442_v38 = vrot.slane %v1428_v6, %v5283_v9  ;;  %v1674_v39 = vpop.permute.xlu0 %1673 }
 0x49d   : > { %v1672_v40 = vpop.permute.xlu1 %1671  ;;  %v1763_v41 = vcombine.low %v1662_v18, %v1674_v39  ;;  %v1764_v42 = vcombine.high %v1662_v18, %v1674_v39  ;;  %v1511_v43 = vcombine.low %v5448_v23, %v1503_v31  ;;  %v1512_v44 = vcombine.high %v5448_v23, %v1503_v31 }
 0x49e   : > { %v1583_v45 = vcombine.low %v1419_v5, %v1426_v35  ;;  %v3772_v46 = vcombine.high %v1419_v5, %v1426_v35  ;;  %v1599_v47 = vcombine.low %v1435_v36, %v1442_v38  ;;  %v3773_v48 = vcombine.high %v1435_v36, %v1442_v38 }
 0x49f   : > { %v1695_v49 = vcombine.low %v1660_v4, %v1672_v40  ;;  %v1696_v50 = vcombine.high %v1660_v4, %v1672_v40  ;;  %v5464_v59 = vrot.slane %v1763_v41, %v5265_v2  ;;  %v5467_v60 = vrot.slane %v1764_v42, %v5265_v2 }
 0x4a0   : > { %v5470_v61 = vrot.slane %v1583_v45, %v5265_v2  ;;  %v5473_v62 = vrot.slane %v3772_v46, %v5265_v2  ;;  %v5476_v1 = vrot.slane %v1599_v47, %v5265_v2  ;;  %v5479_v3 = vrot.slane %v3773_v48, %v5265_v2  ;;  %v1680_v5 = vpop.permute.xlu0 %1679 }
 0x4a1   : > { %v1703_v4 = vrot.slane %v1695_v49, %v5265_v2  ;;  %v1710_v7 = vrot.slane %v1696_v50, %v5265_v2  ;;  %v1678_v10 = vpop.permute.xlu1 %1677  ;;  %v1555_v11 = vrot.slane %v1547_v33, %v5283_v9  ;;  %v1563_v12 = vcombine.low %v5451_v63, %v5455_v32 }
 0x4a2   : > { %v1711_v54 = vcombine.low %v1666_v22, %v1678_v10  ;;  %v1712_v13 = vcombine.high %v1666_v22, %v1678_v10  ;;  %v1564_v15 = vcombine.high %v5451_v63, %v5455_v32  ;;  %v1615_v16 = vcombine.low %v5470_v61, %v5473_v62 }
 0x4a3   : > { %v1571_v17 = vrot.slane %v1563_v12, %v5283_v9  ;;  %v1631_v18 = vcombine.low %v5476_v1, %v5479_v3  ;;  %v5494_v19 = vrot.slane %v1480_v0, %v5283_v9  ;;  %v5497_v20 = vrot.slane %v1496_v24, %v5283_v9 }
 0x4a4   : > { %v1719_v23 = vrot.slane %v1711_v54, %v5265_v2  ;;  %v1726_v22 = vrot.slane %v1712_v13, %v5265_v2  ;;  %v1623_v14 = vrot.slane %v1615_v16, %v5283_v9  ;;  %v5503_v63 = vrot.slane %v1548_v34, %v5283_v9 }
 0x4a5   : > { %v1579_v26 = vcombine.low %v1555_v11, %v1571_v17  ;;  %v1580_v25 = vcombine.high %v1555_v11, %v1571_v17  ;;  %v1668_v30 = vpop.permute.xlu1 %1667  ;;  %v1639_v6 = vrot.slane %v1631_v18, %v5283_v9  ;;  %v1513_v0 = vcombine.low %v5494_v19, %v5497_v20 }
 0x4a6   : > { %v1727_v31 = vcombine.low %v1703_v4, %v1719_v23  ;;  %v1728_v24 = vcombine.high %v1703_v4, %v1719_v23  ;;  %v1743_v32 = vcombine.low %v1710_v7, %v1726_v22  ;;  %v1744_v33 = vcombine.high %v1710_v7, %v1726_v22 }
 0x4a7   : > { %v1651_v35 = vpack.c.bf16 %v1579_v26, %v1511_v43  ;;  %v1653_v36 = vpack.c.bf16 %v1580_v25, %v1512_v44  ;;  %v1779_v38 = vcombine.low %v1668_v30, %v1680_v5  ;;  %v1780_v39 = vcombine.high %v1668_v30, %v1680_v5 }
 0x4a8   : > { %v1735_v34 = vrot.slane %v1727_v31, %v5283_v9  ;;  %v1742_v40 = vrot.slane %v1728_v24, %v5283_v9  ;;  %v1751_v41 = vrot.slane %v1743_v32, %v5283_v9  ;;  %v1758_v42 = vrot.slane %v1744_v33, %v5283_v9 }
 0x4a9   : > { %3974 = vmatprep.subr.msk.bf16.mxu1 %vm2111_vm1, %v1651_v35  ;;  %3976 = vmatprep.subr.msk.bf16.mxu0 %vm2111_vm1, %v1653_v36  ;;  %v2119_v45 = vsel %vm2111_vm1, %v1651_v35, 0  ;;  %v2179_v46 = vsel %vm2111_vm1, %v1653_v36, 0  ;;  %v1787_v43 = vrot.slane %v1779_v38, %v5265_v2  ;;  %v1794_v44 = vrot.slane %v1780_v39, %v5265_v2 }
 0x4aa   : > { %v1899_v47 = vcombine.low %v1735_v34, %v1742_v40  ;;  %v3774_v48 = vcombine.high %v1735_v34, %v1742_v40  ;;  %v1915_v49 = vcombine.low %v1751_v41, %v1758_v42  ;;  %v3775_v50 = vcombine.high %v1751_v41, %v1758_v42  ;;  %3883 = vmatpush3.bf16.xpose.msra.mxu1 %v2119_v45 }
 0x4ab   : > { %3891 = vmatpush3.bf16.xpose.msra.mxu0 %v2179_v46  ;;  %v1795_v4 = vcombine.low %v5464_v59, %v1787_v43  ;;  %v1796_v7 = vcombine.high %v5464_v59, %v1787_v43  ;;  %v1811_v10 = vcombine.low %v5467_v60, %v1794_v44  ;;  %v1812_v11 = vcombine.high %v5467_v60, %v1794_v44 }
 0x4ac   : > { %v5523_v12 = vrot.slane %v1899_v47, %v5265_v2  ;;  %v5526_v54 = vrot.slane %v3774_v48, %v5265_v2  ;;  %v5529_v13 = vrot.slane %v1915_v49, %v5265_v2  ;;  %v5532_v16 = vrot.slane %v3775_v50, %v5265_v2 }
 0x4ad   : > { %v1803_v17 = vrot.slane %v1795_v4, %v5283_v9  ;;  %v1810_v59 = vrot.slane %v1796_v7, %v5283_v9  ;;  %v1819_v18 = vrot.slane %v1811_v10, %v5283_v9  ;;  %v1826_v60 = vrot.slane %v1812_v11, %v5283_v9 }
 0x4ae   : > { %v1647_v23 = vcombine.low %v1623_v14, %v1639_v6  ;;  %v1648_v22 = vcombine.high %v1623_v14, %v1639_v6  ;;  %v1578_v26 = vrot.slane %v1564_v15, %v5283_v9  ;;  %v1514_v25 = vcombine.high %v5494_v19, %v5497_v20 }
 0x4af   : > { %v1967_v30 = vcombine.low %v1803_v17, %v1810_v59  ;;  %v3776_v31 = vcombine.high %v1803_v17, %v1810_v59  ;;  %v1983_v24 = vcombine.low %v1819_v18, %v1826_v60  ;;  %v3777_v32 = vcombine.high %v1819_v18, %v1826_v60 }
 0x4b0   : > { %v1652_v33 = vpack.c.bf16 %v1647_v23, %v1647_v23  ;;  %v1654_v5 = vpack.c.bf16 %v1648_v22, %v1648_v22  ;;  %v1581_v35 = vcombine.low %v5503_v63, %v1578_v26  ;;  %v1582_v36 = vcombine.high %v5503_v63, %v1578_v26 }
 0x4b1   : > { %v1974_v38 = vrot.slane %v1967_v30, %v5265_v2  ;;  %v1982_v39 = vrot.slane %v3776_v31, %v5265_v2  ;;  %v1990_v14 = vrot.slane %v1983_v24, %v5265_v2  ;;  %v1998_v15 = vrot.slane %v3777_v32, %v5265_v2 }
 0x4b2   : > { %3975 = vmatprep.subr.msk.bf16.mxu1 %vm2111_vm1, %v1652_v33  ;;  %3977 = vmatprep.subr.msk.bf16.mxu0 %vm2111_vm1, %v1654_v5  ;;  %v2122_v19 = vsel %vm2111_vm1, %v1652_v33, 0  ;;  %v2182_v20 = vsel %vm2111_vm1, %v1654_v5, 0  ;;  %v1655_v6 = vpack.c.bf16 %v1581_v35, %v1513_v0  ;;  %v1657_v34 = vpack.c.bf16 %v1582_v36, %v1514_v25 }
 0x4b3   : > { %3885 = vmatpush3.bf16.xpose.msra.mxu1 %v2122_v19  ;;  %3893 = vmatpush3.bf16.xpose.msra.mxu0 %v2182_v20  ;;  %v1616_v63 = vcombine.high %v5470_v61, %v5473_v62  ;;  %v1632_v40 = vcombine.high %v5476_v1, %v5479_v3  ;;  %v1196_v41 = vcombine.high %v5404_v8, %v5407_v51 }
 0x4b4   : > { %3978 = vmatprep.subr.msk.bf16.mxu1 %vm2111_vm1, %v1655_v6  ;;  %3980 = vmatprep.subr.msk.bf16.mxu0 %vm2111_vm1, %v1657_v34  ;;  %v1999_v45 = vcombine.low %v1974_v38, %v1982_v39  ;;  %v2015_v46 = vcombine.low %v1990_v14, %v1998_v15  ;;  %v1200_v43 = vpack.c.bf16 %v5415_v21, %v5415_v21  ;;  %v2239_v10 = vsel %vm2111_vm1, %v1655_v6, 0 }
 0x4b5   : > { %v1630_v42 = vrot.slane %v1616_v63, %v5283_v9  ;;  %v1646_v0 = vrot.slane %v1632_v40, %v5283_v9  ;;  %v1932_v61 = vcombine.high %v5523_v12, %v5526_v54  ;;  %v1948_v62 = vcombine.high %v5529_v13, %v5532_v16 }
 0x4b6   : > { %v1931_v8 = vcombine.low %v5523_v12, %v5526_v54  ;;  %v2000_v51 = vcombine.high %v1974_v38, %v1982_v39  ;;  %v1202_v44 = vpack.c.bf16 %v1196_v41, %v1196_v41  ;;  %v1947_v47 = vcombine.low %v5529_v13, %v5532_v16 }
 0x4b7   : > { %v1649_v1 = vcombine.low %v1630_v42, %v1646_v0  ;;  %v1650_v3 = vcombine.high %v1630_v42, %v1646_v0  ;;  %v1946_v48 = vrot.slane %v1932_v61, %v5283_v9  ;;  %v1962_v21 = vrot.slane %v1948_v62, %v5283_v9 }
 0x4b8   : > { %v1164_v49 = vcombine.high %v5388_v53, %v5391_v56  ;;  %v1180_v50 = vcombine.high %v5394_v57, %v5397_v58  ;;  %v2007_v4 = vrot.slane %v1999_v45, %v5283_v9  ;;  %v2023_v7 = vrot.slane %v2015_v46, %v5283_v9 }
 0x4b9   : > { %v1965_v11 = vcombine.low %v1946_v48, %v1962_v21  ;;  %v2014_v12 = vrot.slane %v2000_v51, %v5283_v9  ;;  %v2016_v54 = vcombine.high %v1990_v14, %v1998_v15  ;;  %v2299_v53 = vsel %vm2111_vm1, %v1657_v34, 0 }
 0x4ba   : > { %3887 = vmatmul.mubr.msk.bf16.vlgmr.msra.gmra.mrb[0].mxu1 %vm2111_vm1, %v1200_v43  ;;  %3895 = vmatmul.mubr.msk.bf16.vlgmr.msra.gmra.mrb[4].mxu0 %vm2111_vm1, %v1202_v44  ;;  %v1656_v56 = vpack.c.bf16 %v1649_v1, %v1649_v1  ;;  %v1658_v57 = vpack.c.bf16 %v1650_v3, %v1650_v3  ;;  %v1939_v58 = vrot.slane %v1931_v8, %v5283_v9 }
 0x4bb   : > { %3899 = vmatpush3.bf16.xpose.msra.mxu1 %v2239_v10  ;;  %3902 = vmatprep.mubr.msk.bf16.mxu1 %vm2111_vm1, %v5363_v27  ;;  %v1955_v13 = vrot.slane %v1947_v47, %v5283_v9  ;;  %v2030_v16 = vrot.slane %v2016_v54, %v5283_v9  ;;  %v1966_v17 = vcombine.high %v1946_v48, %v1962_v21 }
 0x4bc   : > { %3907 = vmatpush3.bf16.xpose.msra.mxu0 %v2299_v53  ;;  %3910 = vmatprep.mubr.msk.bf16.mxu0 %vm2111_vm1, %v5365_v29  ;;  %v2031_v27 = vcombine.low %v2007_v4, %v2023_v7  ;;  %v2032_v60 = vcombine.high %v2007_v4, %v2023_v7  ;;  %v1178_v23 = vrot.slane %v1164_v49, %v5283_v9  ;;  %v2242_v31 = vsel %vm2111_vm1, %v1656_v56, 0 }
 0x4bd   : > { %3979 = vmatprep.subr.msk.bf16.mxu1 %vm2111_vm1, %v1656_v56  ;;  %3981 = vmatprep.subr.msk.bf16.mxu0 %vm2111_vm1, %v1658_v57  ;;  %v2033_v59 = vcombine.low %v2014_v12, %v2030_v16  ;;  %v2034_v18 = vcombine.high %v2014_v12, %v2030_v16  ;;  %v1963_v22 = vcombine.low %v1939_v58, %v1955_v13  ;;  %v2302_v32 = vsel %vm2111_vm1, %v1658_v57, 0 }
 0x4be   : > { %v1194_v26 = vrot.slane %v1180_v50, %v5283_v9  ;;  %v1964_v30 = vcombine.high %v1939_v58, %v1955_v13 }
 0x4bf   : > { %v5595_v25 = vpack.c.bf16 %v2033_v59, %v1965_v11  ;;  %v5597_v29 = vpack.c.bf16 %v2034_v18, %v1966_v17  ;;  %v2103_v24 = vpack.c.bf16 %v2031_v27, %v1963_v22 }
 0x4c0   : > { %v2105_v33 = vpack.c.bf16 %v2032_v60, %v1964_v30  ;;  %v1197_v5 = vcombine.low %v1178_v23, %v1194_v26  ;;  %v1198_v35 = vcombine.high %v1178_v23, %v1194_v26 }
 0x4c2   : > { %v1204_v36 = vpack.c.bf16 %v1197_v5, %v1197_v5  ;;  %v1206_v38 = vpack.c.bf16 %v1198_v35, %v1198_v35 }
 0x4c3   : > { %3901 = vmatpush3.bf16.xpose.msra.mxu1 %v2242_v31 }
 0x4c4   : > { %3909 = vmatpush3.bf16.xpose.msra.mxu0 %v2302_v32  ;;  %3914 = vmatprep.subr.bf16.mxu1 %v2103_v24 }
 0x4c5   : > { %3922 = vmatprep.subr.bf16.mxu0 %v2105_v33 }
 0x4ca   : > { %3903 = vmatmul.mubr.msk.bf16.vlgmr.msra.gmra.mrb[4].mxu1 %vm2111_vm1, %v1204_v36 }
 0x4cb   : > { %3911 = vmatmul.mubr.msk.bf16.vlgmr.msra.gmra.mrb[8].mxu0 %vm2111_vm1, %v1206_v38  ;;  %3915 = vmatpush3.bf16.msra.mxu1 %v2103_v24 }
 0x4cc   : > { %3923 = vmatpush3.bf16.msra.mxu0 %v2105_v33 }
 0x58d   : > { %v3888_v39 = vpop.f32.mrb[0].mxu1  ;;  %v3896_v14 = vpop.f32.mrb[4].mxu0 }
 0x58e   : > { %v2354_v15 = vmul.f32 0.35355338, %v3888_v39  ;;  %v2357_v19 = vmul.f32 0.35355338, %v3896_v14  ;;  %v2158_v20 = vpop.f32.mrb[1].mxu1  ;;  %v2218_v6 = vpop.f32.mrb[5].mxu0 }
 0x58f   : > { %v2352_v34 = vmul.f32 0.35355338, %v2158_v20  ;;  %v3889_v63 = vpop.f32.mrb[2].mxu1  ;;  %v3897_v40 = vpop.f32.mrb[6].mxu0  ;;  %v2355_v41 = vmul.f32 0.35355338, %v2218_v6 }
 0x590   : > { %v2161_v42 = vpop.f32.mrb[3].mxu1  ;;  %v2221_v0 = vpop.f32.mrb[7].mxu0  ;;  %v2380_v45 = vsel %vm2364_vm2, %v2357_v19, -inf  ;;  %v2371_v46 = vsel %vm2364_vm2, %v2354_v15, -inf }
 0x591   : > { %2381 = vmax.xlane.f32.xlu0 %v2380_v45  ;;  %2372 = vmax.xlane.f32.xlu1 %v2371_v46  ;;  %v5605_v43 = vmul.f32 0.35355338, %v2161_v42  ;;  %v2374_v61 = vsel %vm2364_vm2, %v2355_v41, -inf  ;;  %v2365_v62 = vsel %vm2364_vm2, %v2352_v34, -inf  ;;  %v5609_v1 = vmul.f32 0.35355338, %v2221_v0 }
 0x593   : > { %v2368_v3 = vsel %vm2364_vm2, %v5605_v43, -inf  ;;  %v2377_v8 = vsel %vm2364_vm2, %v5609_v1, -inf }
 0x595   : > { %2375 = vmax.xlane.f32.xlu0 %v2374_v61  ;;  %2366 = vmax.xlane.f32.xlu1 %v2365_v62 }
 0x599   : > { %2369 = vmax.xlane.f32.xlu0 %v2368_v3 }
 0x59d   : > { %2378 = vmax.xlane.f32.xlu0 %v2377_v8  ;;  %v3904_v51 = vpop.f32.mrb[4].mxu1 }
 0x59e   : > { %v3912_v44 = vpop.f32.mrb[8].mxu0  ;;  %v5615_v47 = vmul.f32 0.35355338, %v3904_v51  ;;  %v2278_v48 = vpop.f32.mrb[5].mxu1 }
 0x59f   : > { %v5617_v21 = vmul.f32 0.35355338, %v3912_v44  ;;  %v2338_v49 = vpop.f32.mrb[9].mxu0  ;;  %v3905_v50 = vpop.f32.mrb[6].mxu1  ;;  %v5619_v4 = vmul.f32 0.35355338, %v2278_v48 }
 0x5a0   : > { %v3913_v7 = vpop.f32.mrb[10].mxu0  ;;  %v2281_v10 = vpop.f32.mrb[7].mxu1  ;;  %v2389_v11 = vsel %vm2364_vm2, %v5615_v47, -inf  ;;  %v2361_v57 = vmul.f32 0.35355338, %v2338_v49 }
 0x5a1   : > { %v5623_v12 = vmul.f32 0.35355338, %v2281_v10  ;;  %v2341_v54 = vpop.f32.mrb[11].mxu0  ;;  %v2398_v53 = vsel %vm2364_vm2, %v5617_v21, -inf  ;;  %2390 = vmax.xlane.f32.xlu1 %v2389_v11  ;;  %v2383_v58 = vsel %vm2364_vm2, %v5619_v4, -inf }
 0x5a2   : > { %2399 = vmax.xlane.f32.xlu0 %v2398_v53  ;;  %v5631_v13 = vmul.f32 0.35355338, %v2341_v54  ;;  %v2392_v16 = vsel %vm2364_vm2, %v2361_v57, -inf }
 0x5a3   : > { %v2386_v56 = vsel %vm2364_vm2, %v5623_v12, -inf }
 0x5a4   : > { %v2395_v17 = vsel %vm2364_vm2, %v5631_v13, -inf }
 0x5a5   : > { %2384 = vmax.xlane.f32.xlu1 %v2383_v58 }
 0x5a6   : > { %2387 = vmax.xlane.f32.xlu0 %v2386_v56 }
 0x5a9   : > { %2393 = vmax.xlane.f32.xlu1 %v2392_v16 }
 0x5aa   : > { %2396 = vmax.xlane.f32.xlu0 %v2395_v17 }
 0x5ba   : > { %1663 = vrot.lane.b32.xlu1 %v5248_v55, %s4747_s20 }
 0x5c0   : > { %1669 = vrot.lane.b32.xlu0 %v5311_v28, %s4747_s20 }
 0x61e   : > { %v2373_v27 = vpop.xlane.xlu1 %2372  ;;  %v2382_v59 = vpop.xlane.xlu0 %2381 }
 0x61f   : > { %v2403_v18 = vsub.f32 %v2354_v15, %v2373_v27  ;;  %v2406_v60 = vsub.f32 %v2357_v19, %v2382_v59 }
 0x621   : > { %v2417_v23 = vmul.f32 1.442695, %v2403_v18  ;;  %v2423_v22 = vmul.f32 1.442695, %v2406_v60 }
 0x622   : > { %v2367_v26 = vpop.xlane.xlu1 %2366  ;;  %v2376_v30 = vpop.xlane.xlu0 %2375 }
 0x623   : > { %4203 = vpow2.f32 %v2417_v23  ;;  %v2401_v31 = vsub.f32 %v2352_v34, %v2367_v26  ;;  %v2404_v24 = vsub.f32 %v2355_v41, %v2376_v30 }
 0x624   : > { %4205 = vpow2.f32 %v2423_v22 }
 0x625   : > { %v2413_v32 = vmul.f32 1.442695, %v2401_v31  ;;  %v2419_v33 = vmul.f32 1.442695, %v2404_v24 }
 0x626   : > { %v2370_v15 = vpop.xlane.xlu0 %2369 }
 0x627   : > { %4207 = vpow2.f32 %v2413_v32  ;;  %v2402_v34 = vsub.f32 %v5605_v43, %v2370_v15 }
 0x628   : > { %4209 = vpow2.f32 %v2419_v33 }
 0x629   : > { %v2415_v40 = vmul.f32 1.442695, %v2402_v34 }
 0x62a   : > { %v2379_v20 = vpop.xlane.xlu0 %2378 }
 0x62b   : > { %v2405_v41 = vsub.f32 %v5609_v1, %v2379_v20  ;;  %4211 = vpow2.f32 %v2415_v40 }
 0x62d   : > { %v5640_v55 = vpop.eup %4203  ;;  %v2421_v46 = vmul.f32 1.442695, %v2405_v41 }
 0x62e   : > { %v5642_v5 = vpop.eup %4205  ;;  %v2443_v28 = vsel %vm2364_vm2, %v5640_v55, 0.0  ;;  %v2391_v19 = vpop.xlane.xlu1 %2390 }
 0x62f   : > { %2444 = vadd.xlane.f32.xlu1 %v2443_v28  ;;  %v2452_v35 = vsel %vm2364_vm2, %v5642_v5, 0.0  ;;  %v2400_v63 = vpop.xlane.xlu0 %2399  ;;  %4213 = vpow2.f32 %v2421_v46 }
 0x630   : > { %2453 = vadd.xlane.f32.xlu0 %v2452_v35  ;;  %v2412_v48 = vsub.f32 %v5617_v21, %v2400_v63 }
 0x631   : > { %v5648_v36 = vpop.eup %4207 }
 0x632   : > { %v2437_v38 = vsel %vm2364_vm2, %v5648_v36, 0.0  ;;  %v5652_v39 = vpop.eup %4209  ;;  %v2385_v6 = vpop.xlane.xlu1 %2384 }
 0x633   : > { %2438 = vadd.xlane.f32.xlu1 %v2437_v38  ;;  %v2446_v14 = vsel %vm2364_vm2, %v5652_v39, 0.0  ;;  %v2407_v0 = vsub.f32 %v5619_v4, %v2385_v6  ;;  %v2388_v45 = vpop.xlane.xlu0 %2387  ;;  %v2435_v4 = vmul.f32 1.442695, %v2412_v48 }
 0x635   : > { %v2425_v62 = vmul.f32 1.442695, %v2407_v0  ;;  %v5666_v44 = vpop.eup %4211 }
 0x636   : > { %v2394_v42 = vpop.xlane.xlu1 %2393 }
 0x637   : > { %2447 = vadd.xlane.f32.xlu1 %v2446_v14  ;;  %v2410_v61 = vsub.f32 %v2361_v57, %v2394_v42  ;;  %v2397_v8 = vpop.xlane.xlu0 %2396  ;;  %4215 = vpow2.f32 %v2425_v62 }
 0x638   : > { %v2411_v1 = vsub.f32 %v5631_v13, %v2397_v8 }
 0x639   : > { %v2431_v3 = vmul.f32 1.442695, %v2410_v61  ;;  %v5671_v50 = vpop.eup %4213 }
 0x63a   : > { %v2433_v49 = vmul.f32 1.442695, %v2411_v1  ;;  %v2449_v10 = vsel %vm2364_vm2, %v5671_v50, 0.0  ;;  %v1664_v27 = vpop.permute.xlu1 %1663 }
 0x63b   : > { %4217 = vpow2.f32 %v2431_v3  ;;  %v1670_v59 = vpop.permute.xlu0 %1669 }
 0x641   : > { %v5673_v7 = vpop.eup %4215 }
 0x642   : > { %v2455_v21 = vsel %vm2364_vm2, %v5673_v7, 0.0 }
 0x645   : > { %v5677_v11 = vpop.eup %4217 }
 0x646   : > { %1681 = vrot.lane.b32.xlu0 %v5333_v52, %s4747_s20  ;;  %v2409_v52 = vsub.f32 %v5615_v47, %v2391_v19  ;;  %v2440_v47 = vsel %vm2364_vm2, %v5666_v44, 0.0  ;;  %v2464_v54 = vsel %vm2364_vm2, %v5677_v11, 0.0 }
 0x648   : > { %1675 = vrot.lane.b32.xlu1 %v5319_v37, %s4747_s20  ;;  %v2408_v37 = vsub.f32 %v5623_v12, %v2388_v45  ;;  %v2429_v43 = vmul.f32 1.442695, %v2409_v52  ;;  %s4751_s20 = smov [#allocation23]  }
 0x64a   : > { %v2427_v51 = vmul.f32 1.442695, %v2408_v37  ;;  %4219 = vpow2.f32 %v2429_v43 }
 0x64c   : > { %4221 = vpow2.f32 %v2427_v51 }
 0x64d   : > { %4223 = vpow2.f32 %v2433_v49 }
 0x64e   : > { %4225 = vpow2.f32 %v2435_v4 }
 0x654   : > { %v5681_v12 = vpop.eup %4219 }
 0x655   : > { %v2461_v56 = vsel %vm2364_vm2, %v5681_v12, 0.0 }
 0x656   : > { %v5685_v53 = vpop.eup %4221 }
 0x657   : > { %v2458_v57 = vsel %vm2364_vm2, %v5685_v53, 0.0  ;;  %v5691_v58 = vpop.eup %4223 }
 0x658   : > { %v2467_v13 = vsel %vm2364_vm2, %v5691_v58, 0.0  ;;  %v5695_v16 = vpop.eup %4225 }
 0x659   : > { %v2470_v17 = vsel %vm2364_vm2, %v5695_v16, 0.0 }
 0x665   : > { %2441 = vadd.xlane.f32.xlu0 %v2440_v47 }
 0x669   : > { %2450 = vadd.xlane.f32.xlu0 %v2449_v10 }
 0x66c   : > { %2456 = vadd.xlane.f32.xlu1 %v2455_v21 }
 0x66d   : > { %2465 = vadd.xlane.f32.xlu0 %v2464_v54 }
 0x670   : > { %2462 = vadd.xlane.f32.xlu1 %v2461_v56 }
 0x671   : > { %2459 = vadd.xlane.f32.xlu0 %v2458_v57 }
 0x675   : > { %2468 = vadd.xlane.f32.xlu0 %v2467_v13 }
 0x679   : > { %2471 = vadd.xlane.f32.xlu0 %v2470_v17 }
 0x6bc   : > { %v2445_v18 = vpop.xlane.xlu1 %2444 }
 0x6bd   : > { %v2454_v60 = vpop.xlane.xlu0 %2453  ;;  %4227 = vrcp.f32 %v2445_v18 }
 0x6c0   : > { %v2439_v23 = vpop.xlane.xlu1 %2438 }
 0x6c1   : > { %v1682_v22 = vpop.permute.xlu0 %1681  ;;  %4229 = vrcp.f32 %v2439_v23 }
 0x6c2   : > { %v1847_v30 = vcombine.low %v1670_v59, %v1682_v22  ;;  %v1848_v31 = vcombine.high %v1670_v59, %v1682_v22 }
 0x6c4   : > { %v2448_v26 = vpop.xlane.xlu1 %2447  ;;  %v1855_v28 = vrot.slane %v1847_v30, %v5265_v2  ;;  %v1862_v35 = vrot.slane %v1848_v31, %v5265_v2 }
 0x6c7   : > { %v4228_v17 = vpop.eup %4227 }
 0x6c8   : > { %v1676_v24 = vpop.permute.xlu1 %1675  ;;  %v2487_v18 = vmul.f32 %v4228_v17, %v5640_v55 }
 0x6c9   : > { %v1831_v32 = vcombine.low %v1664_v27, %v1676_v24  ;;  %v1832_v33 = vcombine.high %v1664_v27, %v1676_v24 }
 0x6cb   : > { %v1839_v38 = vrot.slane %v1831_v32, %v5265_v2  ;;  %v1846_v14 = vrot.slane %v1832_v33, %v5265_v2  ;;  %v4230_v59 = vpop.eup %4229 }
 0x6cd   : > { %v1863_v15 = vcombine.low %v1839_v38, %v1855_v28  ;;  %v1864_v19 = vcombine.high %v1839_v38, %v1855_v28  ;;  %v1879_v20 = vcombine.low %v1846_v14, %v1862_v35  ;;  %v1880_v6 = vcombine.high %v1846_v14, %v1862_v35 }
 0x6cf   : > { %v1871_v34 = vrot.slane %v1863_v15, %v5283_v9  ;;  %v1878_v63 = vrot.slane %v1864_v19, %v5283_v9  ;;  %v1887_v40 = vrot.slane %v1879_v20, %v5283_v9  ;;  %v1894_v41 = vrot.slane %v1880_v6, %v5283_v9 }
 0x6d0   : > { %v2498_v15 = vpack.c.bf16 %v2487_v18, %v2487_v18 }
 0x6d1   : > { %v2035_v42 = vcombine.low %v1871_v34, %v1878_v63  ;;  %v3778_v0 = vcombine.high %v1871_v34, %v1878_v63  ;;  %v2051_v45 = vcombine.low %v1887_v40, %v1894_v41  ;;  %v3779_v46 = vcombine.high %v1887_v40, %v1894_v41 }
 0x6d3   : > { %v2042_v61 = vrot.slane %v2035_v42, %v5265_v2  ;;  %v2050_v52 = vrot.slane %v3778_v0, %v5265_v2  ;;  %v2058_v62 = vrot.slane %v2051_v45, %v5265_v2  ;;  %v2066_v37 = vrot.slane %v3779_v46, %v5265_v2 }
 0x6d5   : > { %v2067_v3 = vcombine.low %v2042_v61, %v2050_v52  ;;  %v2083_v8 = vcombine.low %v2058_v62, %v2066_v37  ;;  %v2068_v56 = vcombine.high %v2042_v61, %v2050_v52  ;;  %v2084_v57 = vcombine.high %v2058_v62, %v2066_v37 }
 0x6d7   : > { %v2075_v43 = vrot.slane %v2067_v3, %v5283_v9  ;;  %v2091_v51 = vrot.slane %v2083_v8, %v5283_v9  ;;  %v2082_v22 = vrot.slane %v2068_v56, %v5283_v9  ;;  %v2098_v30 = vrot.slane %v2084_v57, %v5283_v9 }
 0x6d9   : > { %v2099_v1 = vcombine.low %v2075_v43, %v2091_v51  ;;  %v2100_v48 = vcombine.high %v2075_v43, %v2091_v51  ;;  %v2101_v28 = vcombine.low %v2082_v22, %v2098_v30 }
 0x6db   : > { %v2104_v49 = vpack.c.bf16 %v2099_v1, %v2099_v1  ;;  %v2106_v47 = vpack.c.bf16 %v2100_v48, %v2100_v48 }
 0x6dd   : > { %3982 = vmatprep.subr.msk.bf16.mxu1 %vm2511_vm3, %v2104_v49  ;;  %3983 = vmatprep.subr.msk.bf16.mxu0 %vm2511_vm3, %v2106_v47  ;;  %v2513_v4 = vsel %vm2511_vm3, %v2104_v49, 0  ;;  %v2570_v10 = vsel %vm2511_vm3, %v2106_v47, 0 }
 0x6de   : > { %3917 = vmatpush3.bf16.msra.mxu1 %v2513_v4  ;;  %3925 = vmatpush3.bf16.msra.mxu0 %v2570_v10 }
 0x6df   : > { %3930 = vmatprep.subr.bf16.mxu1 %v5595_v25  ;;  %3938 = vmatprep.subr.bf16.mxu0 %v5597_v29 }
 0x6f2   : > { %v2442_v21 = vpop.xlane.xlu0 %2441 }
 0x6f3   : > { %4231 = vrcp.f32 %v2442_v21 }
 0x6f4   : > { %4233 = vrcp.f32 %v2454_v60 }
 0x6f5   : > { %4235 = vrcp.f32 %v2448_v26  ;;  %v2485_v26 = vmul.f32 %v4230_v59, %v5648_v36  ;;  %v2108_v36 = vpack.c.bf16 %v2101_v28, %v2101_v28 }
 0x6f6   : > { %v2451_v54 = vpop.xlane.xlu0 %2450 }
 0x6f7   : > { %4237 = vrcp.f32 %v2451_v54 }
 0x6f9   : > { %v2457_v13 = vpop.xlane.xlu1 %2456 }
 0x6fa   : > { %v2466_v27 = vpop.xlane.xlu0 %2465  ;;  %4239 = vrcp.f32 %v2457_v13 }
 0x6fd   : > { %v4232_v31 = vpop.eup %4231  ;;  %v2463_v23 = vpop.xlane.xlu1 %2462 }
 0x6fe   : > { %v4234_v24 = vpop.eup %4233  ;;  %4241 = vrcp.f32 %v2463_v23  ;;  %v2460_v60 = vpop.xlane.xlu0 %2459  ;;  %v2486_v32 = vmul.f32 %v4232_v31, %v5666_v44  ;;  %v2102_v44 = vcombine.high %v2082_v22, %v2098_v30 }
 0x6ff   : > { %v4236_v33 = vpop.eup %4235  ;;  %4243 = vrcp.f32 %v2460_v60  ;;  %v2490_v14 = vmul.f32 %v4234_v24, %v5642_v5 }
 0x700   : > { %v2497_v35 = vpack.c.bf16 %v2486_v32, %v2485_v26  ;;  %4245 = vrcp.f32 %v2466_v27  ;;  %v2488_v19 = vmul.f32 %v4236_v33, %v5652_v39  ;;  %v2627_v39 = vsel %vm2511_vm3, %v2108_v36, 0 }
 0x701   : > { %v4238_v38 = vpop.eup %4237  ;;  %v2500_v5 = vpack.c.bf16 %v2490_v14, %v2490_v14 }
 0x702   : > { %3918 = vmatprep.mubr.msk.bf16.mxu1 %vm2364_vm2, %v2497_v35  ;;  %v2469_v55 = vpop.xlane.xlu0 %2468  ;;  %v2489_v20 = vmul.f32 %v4238_v38, %v5671_v50  ;;  %v2110_v50 = vpack.c.bf16 %v2102_v44, %v2102_v44 }
 0x703   : > { %4247 = vrcp.f32 %v2469_v55  ;;  %3919 = vmatmul.mubr.msk.bf16.vlgmr.msra.gmra.mrb[8].mxu1 %vm2364_vm2, %v2498_v15 }
 0x704   : > { %3931 = vmatpush3.bf16.msra.mxu1 %v5595_v25  ;;  %v2499_v6 = vpack.c.bf16 %v2489_v20, %v2488_v19  ;;  %v4240_v63 = vpop.eup %4239  ;;  %v2684_v46 = vsel %vm2511_vm3, %v2110_v50, 0 }
 0x705   : > { %3984 = vmatprep.subr.msk.bf16.mxu1 %vm2511_vm3, %v2108_v36  ;;  %v2491_v42 = vmul.f32 %v4240_v63, %v5673_v7 }
 0x706   : > { %3926 = vmatprep.mubr.msk.bf16.mxu0 %vm2364_vm2, %v2499_v6  ;;  %v2472_v34 = vpop.xlane.xlu0 %2471 }
 0x707   : > { %4249 = vrcp.f32 %v2472_v34  ;;  %3927 = vmatmul.mubr.msk.bf16.vlgmr.msra.gmra.mrb[12].mxu0 %vm2364_vm2, %v2500_v5 }
 0x708   : > { %v4242_v40 = vpop.eup %4241  ;;  %3933 = vmatpush3.bf16.msra.mxu1 %v2627_v39  ;;  %3939 = vmatpush3.bf16.msra.mxu0 %v5597_v29 }
 0x709   : > { %v4244_v41 = vpop.eup %4243  ;;  %v2493_v25 = vmul.f32 %v4242_v40, %v5681_v12  ;;  %3985 = vmatprep.subr.msk.bf16.mxu0 %vm2511_vm3, %v2110_v50 }
 0x70a   : > { %v2492_v0 = vmul.f32 %v4244_v41, %v5685_v53  ;;  %v4246_v45 = vpop.eup %4245 }
 0x70b   : > { %v2502_v61 = vpack.c.bf16 %v2493_v25, %v2493_v25  ;;  %v2494_v29 = vmul.f32 %v4246_v45, %v5677_v11 }
 0x70c   : > { %3941 = vmatpush3.bf16.msra.mxu0 %v2684_v46  ;;  %v2501_v52 = vpack.c.bf16 %v2492_v0, %v2491_v42 }
 0x70d   : > { %v4248_v62 = vpop.eup %4247 }
 0x70e   : > { %3934 = vmatprep.mubr.msk.bf16.mxu1 %vm2364_vm2, %v2501_v52  ;;  %v2495_v37 = vmul.f32 %v4248_v62, %v5691_v58 }
 0x70f   : > { %3935 = vmatmul.mubr.msk.bf16.vlgmr.msra.gmra.mrb[12].mxu1 %vm2364_vm2, %v2502_v61 }
 0x710   : > { %v2503_v12 = vpack.c.bf16 %v2495_v37, %v2494_v29 }
 0x711   : > { %v4250_v3 = vpop.eup %4249 }
 0x712   : > { %v2496_v7 = vmul.f32 %v4250_v3, %v5695_v16  ;;  %3942 = vmatprep.mubr.msk.bf16.mxu0 %vm2364_vm2, %v2503_v12 }
 0x714   : > { %v2504_v53 = vpack.c.bf16 %v2496_v7, %v2496_v7 }
 0x716   : > { %3943 = vmatmul.mubr.msk.bf16.vlgmr.msra.gmra.mrb[16].mxu0 %vm2364_vm2, %v2504_v53 }
 0x7d6   : > { %v3920_v8 = vpop.f32.mrb[8].mxu1 }
 0x7d7   : > { %v2549_v43 = vpop.f32.mrb[9].mxu1 }
 0x7d8   : > { %v3921_v51 = vpop.f32.mrb[10].mxu1 }
 0x7d9   : > { %v2552_v1 = vpop.f32.mrb[11].mxu1 }
 0x7da   : > { %v3928_v48 = vpop.f32.mrb[12].mxu0 }
 0x7db   : > { %v2606_v49 = vpop.f32.mrb[13].mxu0 }
 0x7dc   : > { %v3929_v11 = vpop.f32.mrb[14].mxu0 }
 0x7dd   : > { %v2609_v47 = vpop.f32.mrb[15].mxu0 }
 0x7e2   : > { %v3936_v58 = vpop.f32.mrb[12].mxu1 }
 0x7e3   : > { %v2870_v4 = vcombine.low %v3920_v8, %v3936_v58  ;;  %v2871_v10 = vcombine.high %v3920_v8, %v3936_v58  ;;  %v2663_v21 = vpop.f32.mrb[13].mxu1 }
 0x7e4   : > { %v2734_v54 = vcombine.low %v2549_v43, %v2663_v21  ;;  %v2735_v56 = vcombine.high %v2549_v43, %v2663_v21  ;;  %v3937_v16 = vpop.f32.mrb[14].mxu1 }
 0x7e5   : > { %v2666_v57 = vpop.f32.mrb[15].mxu1  ;;  %v2878_v59 = vrot.slane %v2870_v4, %v5265_v2  ;;  %v2885_v22 = vrot.slane %v2871_v10, %v5265_v2 }
 0x7e6   : > { %v2802_v13 = vcombine.low %v2552_v1, %v2666_v57  ;;  %v2803_v17 = vcombine.high %v2552_v1, %v2666_v57  ;;  %v2742_v23 = vrot.slane %v2734_v54, %v5265_v2  ;;  %v2749_v24 = vrot.slane %v2735_v56, %v5265_v2 }
 0x7e8   : > { %v2810_v33 = vrot.slane %v2802_v13, %v5265_v2  ;;  %v2817_v28 = vrot.slane %v2803_v17, %v5265_v2 }
 0x7e9   : > { %v3944_v27 = vpop.f32.mrb[16].mxu0 }
 0x7ea   : > { %v2886_v30 = vcombine.low %v3928_v48, %v3944_v27  ;;  %v2887_v31 = vcombine.high %v3928_v48, %v3944_v27  ;;  %v2720_v18 = vpop.f32.mrb[17].mxu0 }
 0x7eb   : > { %v2750_v60 = vcombine.low %v2606_v49, %v2720_v18  ;;  %v2751_v26 = vcombine.high %v2606_v49, %v2720_v18  ;;  %v3945_v32 = vpop.f32.mrb[18].mxu0 }
 0x7ec   : > { %v2894_v35 = vrot.slane %v2886_v30, %v5265_v2  ;;  %v2901_v38 = vrot.slane %v2887_v31, %v5265_v2  ;;  %v2723_v14 = vpop.f32.mrb[19].mxu0 }
 0x7ed   : > { %v2758_v15 = vrot.slane %v2750_v60, %v5265_v2  ;;  %v2765_v55 = vrot.slane %v2751_v26, %v5265_v2  ;;  %v2818_v19 = vcombine.low %v2609_v47, %v2723_v14  ;;  %v2819_v20 = vcombine.high %v2609_v47, %v2723_v14 }
 0x7ee   : > { %v2902_v36 = vcombine.low %v2878_v59, %v2894_v35  ;;  %v2903_v44 = vcombine.high %v2878_v59, %v2894_v35  ;;  %v2918_v6 = vcombine.low %v2885_v22, %v2901_v38  ;;  %v2919_v5 = vcombine.high %v2885_v22, %v2901_v38 }
 0x7ef   : > { %v2766_v34 = vcombine.low %v2742_v23, %v2758_v15  ;;  %v2767_v63 = vcombine.high %v2742_v23, %v2758_v15  ;;  %v2782_v39 = vcombine.low %v2749_v24, %v2765_v55  ;;  %v2783_v50 = vcombine.high %v2749_v24, %v2765_v55 }
 0x7f0   : > { %v2910_v40 = vrot.slane %v2902_v36, %v5283_v9  ;;  %v2917_v41 = vrot.slane %v2903_v44, %v5283_v9  ;;  %v2926_v25 = vrot.slane %v2918_v6, %v5283_v9  ;;  %v2933_v42 = vrot.slane %v2919_v5, %v5283_v9 }
 0x7f1   : > { %v2774_v0 = vrot.slane %v2766_v34, %v5283_v9  ;;  %v2781_v45 = vrot.slane %v2767_v63, %v5283_v9  ;;  %v2790_v46 = vrot.slane %v2782_v39, %v5283_v9  ;;  %v2797_v61 = vrot.slane %v2783_v50, %v5283_v9 }
 0x7f2   : > { %v3074_v52 = vcombine.low %v2910_v40, %v2917_v41  ;;  %v3800_v62 = vcombine.high %v2910_v40, %v2917_v41  ;;  %v3090_v29 = vcombine.low %v2926_v25, %v2933_v42  ;;  %v3801_v37 = vcombine.high %v2926_v25, %v2933_v42  ;;  %v4189_v40 = vld [vmem:[#allocation8] sm:$0xff]  }
 0x7f3   : > { %v2938_v12 = vcombine.low %v2774_v0, %v2781_v45  ;;  %v3796_v3 = vcombine.high %v2774_v0, %v2781_v45  ;;  %v2954_v7 = vcombine.low %v2790_v46, %v2797_v61  ;;  %v3797_v53 = vcombine.high %v2790_v46, %v2797_v61  ;;  %3946 = vmatprep.subr.bf16.mxu1 %v4189_v40 }
 0x7f4   : > { %v2826_v8 = vrot.slane %v2818_v19, %v5265_v2  ;;  %v2833_v43 = vrot.slane %v2819_v20, %v5265_v2  ;;  %v3081_v51 = vrot.slane %v3074_v52, %v5265_v2  ;;  %v3089_v1 = vrot.slane %v3800_v62, %v5265_v2  ;;  %3947 = vmatpush3.bf16.msra.mxu1 %v4189_v40 }
 0x7f5   : > { %v2945_v48 = vrot.slane %v2938_v12, %v5265_v2  ;;  %v2953_v49 = vrot.slane %v3796_v3, %v5265_v2  ;;  %v2961_v11 = vrot.slane %v2954_v7, %v5265_v2  ;;  %v2969_v47 = vrot.slane %v3797_v53, %v5265_v2 }
 0x7f6   : > { %v2834_v58 = vcombine.low %v2810_v33, %v2826_v8  ;;  %v2835_v4 = vcombine.high %v2810_v33, %v2826_v8  ;;  %v2850_v10 = vcombine.low %v2817_v28, %v2833_v43  ;;  %v2851_v21 = vcombine.high %v2817_v28, %v2833_v43  ;;  %v4190_v43 = vld [vmem:[#allocation8 + $0x8] sm:$0xff]  }
 0x7f7   : > { %v3097_v54 = vrot.slane %v3090_v29, %v5265_v2  ;;  %v3105_v56 = vrot.slane %v3801_v37, %v5265_v2  ;;  %v3107_v16 = vcombine.high %v3081_v51, %v3089_v1  ;;  %v3106_v57 = vcombine.low %v3081_v51, %v3089_v1  ;;  %3948 = vmatprep.subr.bf16.mxu1 %v4190_v43 }
 0x7f8   : > { %v2842_v13 = vrot.slane %v2834_v58, %v5283_v9  ;;  %v2849_v17 = vrot.slane %v2835_v4, %v5283_v9  ;;  %v2858_v27 = vrot.slane %v2850_v10, %v5283_v9  ;;  %v2865_v59 = vrot.slane %v2851_v21, %v5283_v9  ;;  %3949 = vmatpush3.bf16.msra.mxu1 %v4190_v43 }
 0x7f9   : > { %v3121_v22 = vrot.slane %v3107_v16, %v5283_v9  ;;  %v3123_v30 = vcombine.high %v3097_v54, %v3105_v56  ;;  %v5781_v31 = vrot.slane %v3106_v57, %v5283_v9  ;;  %v3122_v18 = vcombine.low %v3097_v54, %v3105_v56 }
 0x7fa   : > { %v3006_v23 = vcombine.low %v2842_v13, %v2849_v17  ;;  %v3798_v24 = vcombine.high %v2842_v13, %v2849_v17  ;;  %v3022_v60 = vcombine.low %v2858_v27, %v2865_v59  ;;  %v3799_v26 = vcombine.high %v2858_v27, %v2865_v59 }
 0x7fb   : > { %v3137_v32 = vrot.slane %v3123_v30, %v5283_v9  ;;  %v3130_v33 = vrot.slane %v3122_v18, %v5283_v9  ;;  %v2970_v28 = vcombine.low %v2945_v48, %v2953_v49  ;;  %v2986_v35 = vcombine.low %v2961_v11, %v2969_v47 }
 0x7fc   : > { %v3013_v38 = vrot.slane %v3006_v23, %v5265_v2  ;;  %v3021_v14 = vrot.slane %v3798_v24, %v5265_v2  ;;  %v3029_v15 = vrot.slane %v3022_v60, %v5265_v2  ;;  %v3037_v55 = vrot.slane %v3799_v26, %v5265_v2  ;;  %v3802_v60 = vld [vmem:[#allocation10] ss:$0 sm:$0xff] }
 0x7fd   : > { %v3140_v19 = vcombine.low %v3121_v22, %v3137_v32  ;;  %v3139_v20 = vcombine.high %v5781_v31, %v3130_v33  ;;  %v3141_v36 = vcombine.high %v3121_v22, %v3137_v32  ;;  %v2978_v44 = vrot.slane %v2970_v28, %v5283_v9 }
 0x7fe   : > { %v2994_v6 = vrot.slane %v2986_v35, %v5283_v9  ;;  %v3038_v5 = vcombine.low %v3013_v38, %v3021_v14  ;;  %v3054_v34 = vcombine.low %v3029_v15, %v3037_v55  ;;  %v2971_v63 = vcombine.high %v2945_v48, %v2953_v49 }
 0x7ff   : > { %3161 = vrot.lane.b32.xlu1 %v3140_v19, %s4748_s2  ;;  %3149 = vrot.lane.b32.xlu0 %v3139_v20, %s4749_s3  ;;  %v2987_v39 = vcombine.high %v2961_v11, %v2969_v47  ;;  %v3039_v50 = vcombine.high %v3013_v38, %v3021_v14  ;;  %v3055_v2 = vcombine.high %v3029_v15, %v3037_v55  ;;  %v4263_v14 = vld [vmem:[%s5199_s21] sm:$0xff]  ;;  %v4264_v19 = vld [vmem:[%s5199_s21 + $0x8] sm:$0xff] }
 0x800   : > { %v3002_v41 = vcombine.low %v2978_v44, %v2994_v6  ;;  %v3003_v25 = vcombine.high %v2978_v44, %v2994_v6  ;;  %v3046_v42 = vrot.slane %v3038_v5, %v5283_v9  ;;  %v3062_v0 = vrot.slane %v3054_v34, %v5283_v9  ;;  %v4265_v44 = vld [vmem:[%s5199_s21 + $0x10] sm:$0xff]  ;;  %s3989_s21 = smul.u32 384, %s5943_s24  ;;  %s5956_s24 = sld [smem:[#allocation39_spill]] }
 0x801   : > { %v2985_v45 = vrot.slane %v2971_v63, %v5283_v9  ;;  %v3001_v46 = vrot.slane %v2987_v39, %v5283_v9  ;;  %v3053_v61 = vrot.slane %v3039_v50, %v5283_v9  ;;  %v3069_v52 = vrot.slane %v3055_v2, %v5283_v9 }
 0x802   : > { %v3071_v62 = vcombine.high %v3046_v42, %v3062_v0  ;;  %v3070_v29 = vcombine.low %v3046_v42, %v3062_v0  ;;  %v3138_v37 = vcombine.low %v5781_v31, %v3130_v33 }
 0x803   : > { %3173 = vrot.lane.b32.xlu0 %v3141_v36, %s4750_s19  ;;  %v3004_v12 = vcombine.low %v2985_v45, %v3001_v46  ;;  %v3072_v3 = vcombine.low %v3053_v61, %v3069_v52  ;;  %v3005_v7 = vcombine.high %v2985_v45, %v3001_v46  ;;  %v3073_v53 = vcombine.high %v3053_v61, %v3069_v52 }
 0x804   : > { %v4172_v8 = vpack.i.bf16 %v3071_v62, %v3003_v25 }
 0x805   : > { %v4177_v51 = vpack.i.bf16 %v3072_v3, %v3004_v12  ;;  %v4182_v1 = vpack.i.bf16 %v3073_v53, %v3005_v7  ;;  %v4192_v12 = vld [vmem:[#allocation17 + $0x8] sm:$0xff]  }
 0x806   : > { %4173 = vrot.lane.b32.xlu1 %v4172_v8, %s4749_s3  ;;  %s5847_s16 = scalar_lea.hbm %s5956_s24, %s3989_s21 }
 0x80a   : > { %4178 = vrot.lane.b32.xlu1 %v4177_v51, %s4748_s2  ;;  %s4636_s2 = sshll.u32 %s4751_s20, 4  ;;  %s4637_s2 = int_to_ptr.vmem [resolvable:$false] %s4636_s2 }
 0x80b   : > { %p4639_p11 = scmp.lt.s32.totalorder %s5840_s25, %s4637_s2 }
 0x80e   : > { %4183 = vrot.lane.b32.xlu1 %v4182_v1, %s4750_s19  ;;  %s4638_s19 = scalar_lea.vmem %s4637_s2, 768 }
 0x80f   : > { %p4640_p0 = scmp.lt.s32.totalorder %s4638_s19, %s4632_s1 }
 0x811   : > { %p4641_p6 = por %p4640_p0, %p4639_p11 }
 0x813   : > { %p4642_p7 = pnand %p4641_p6, %p4635_p10 }
 0x871   : > { %v3162_v9 = vpop.permute.xlu1 %3161  ;;  %v3150_v49 = vpop.permute.xlu0 %3149 }
 0x872   : > { %v3180_v47 = vsel %vm2111_vm1, %v3138_v37, %v3150_v49  ;;  %v4191_v37 = vld [vmem:[#allocation17] sm:$0xff]  }
 0x873   : > { %v3184_v56 = vsel %vm3181_vm4, %v3180_v47, %v3162_v9  ;;  %3954 = vmatprep.subr.bf16.mxu0 %v4191_v37 }
 0x874   : > { %3955 = vmatpush3.bf16.msra.mxu0 %v4191_v37 }
 0x875   : > { %v3174_v54 = vpop.permute.xlu0 %3173  ;;  %3956 = vmatprep.subr.bf16.mxu0 %v4192_v12 }
 0x876   : > { %v3187_v59 = vsel %vm2364_vm2, %v3184_v56, %v3174_v54 }
 0x877   : > { %v3189_v24 = vpack.c.bf16 %v3187_v59, %v3187_v59 }
 0x878   : > { %v4174_v48 = vpop.permute.xlu1 %4173  ;;  %3957 = vmatpush3.bf16.msra.mxu0 %v4192_v12 }
 0x879   : > { %v4176_v58 = vunpack.i.h.bf16 %v4174_v48  ;;  %v4175_v4 = vunpack.i.l.bf16 %v4174_v48 }
 0x87b   : > { %v3178_v57 = vsel %vm2111_vm1, %v3002_v41, %v4175_v4  ;;  %v3179_v13 = vsel %vm2111_vm1, %v3070_v29, %v4176_v58 }
 0x87c   : > { %v4179_v11 = vpop.permute.xlu1 %4178 }
 0x87d   : > { %v4181_v10 = vunpack.i.h.bf16 %v4179_v11  ;;  %v4180_v21 = vunpack.i.l.bf16 %v4179_v11  ;;  %v3807_v11 = vld [vmem:[#allocation14] ss:$0 sm:$0xff] }
 0x87f   : > { %v3182_v22 = vsel %vm3181_vm4, %v3178_v57, %v4180_v21  ;;  %v3183_v30 = vsel %vm3181_vm4, %v3179_v13, %v4181_v10  ;;  %v3808_v21 = vld [vmem:[#allocation16] ss:$0 sm:$0xff] }
 0x880   : > { %v4184_v16 = vpop.permute.xlu1 %4183 }
 0x881   : > { %v4186_v17 = vunpack.i.h.bf16 %v4184_v16  ;;  %v4185_v27 = vunpack.i.l.bf16 %v4184_v16 }
 0x883   : > { %v3185_v31 = vsel %vm2364_vm2, %v3182_v22, %v4185_v27  ;;  %v3186_v18 = vsel %vm2364_vm2, %v3183_v30, %v4186_v17  ;;  %v4193_v30 = vld [vmem:[#allocation20] sm:$0xff]  }
 0x884   : > { %v3188_v23 = vpack.c.bf16 %v3186_v18, %v3185_v31  ;;  %3962 = vmatprep.subr.bf16.mxu1 %v4193_v30  ;;  %v4194_v31 = vld [vmem:[#allocation20 + $0x8] sm:$0xff]   ;;  %v4195_v18 = vld [vmem:[#allocation20 + $0x10] sm:$0xff]  }
 0x886   : > { %3950 = vmatprep.mubr.msk.bf16.mxu1 %vm623_vm0, %v3188_v23  ;;  %v4196_v23 = vld [vmem:[#allocation20 + $0x18] sm:$0xff]  }
 0x887   : > { %3951 = vmatmul.mubr.msk.bf16.vlgmr.msra.gmra.mrb[16].mxu1 %vm623_vm0, %v3189_v24  ;;  %v3809_v24 = vld [vmem:[#allocation19] ss:$0 sm:$0xff] }
 0x888   : > { %3963 = vmatpush3.bf16.msra.mxu1 %v4193_v30 }
 0x889   : > { %3964 = vmatprep.subr.bf16.mxu1 %v4194_v31 }
 0x88c   : > { %3965 = vmatpush3.bf16.msra.mxu1 %v4194_v31 }
 0x88d   : > { %3966 = vmatprep.subr.bf16.mxu1 %v4195_v18 }
 0x890   : > { %3967 = vmatpush3.bf16.msra.mxu1 %v4195_v18 }
 0x891   : > { %3968 = vmatprep.subr.bf16.mxu1 %v4196_v23 }
 0x894   : > { %3969 = vmatpush3.bf16.msra.mxu1 %v4196_v23 }
 0x95a   : > { %v3952_v26 = vpop.f32.mrb[16].mxu1 }
 0x95b   : > { %v3253_v32 = vpop.f32.mrb[17].mxu1  ;;  %v3262_v38 = vadd.f32 %v3952_v26, %v3802_v60 }
 0x95c   : > { %v3254_v33 = vadd.f32 %v3802_v60, %v3253_v32  ;;  %v3953_v28 = vpop.f32.mrb[18].mxu1 }
 0x95d   : > { %v3256_v35 = vpop.f32.mrb[19].mxu1  ;;  %v5820_v6 = vadd.f32 %v4265_v44, %v3262_v38 }
 0x95e   : > { %v5812_v15 = vadd.f32 %v4263_v14, %v3254_v33  ;;  %v3257_v55 = vadd.f32 %v3802_v60, %v3256_v35 }
 0x95f   : > { %v3278_v34 = vsel %vm623_vm0, %v5820_v6, 0.0 }
 0x960   : > { %v5815_v20 = vadd.f32 %v4264_v19, %v3257_v55  ;;  %v3272_v36 = vsel %vm623_vm0, %v5812_v15, 0.0 }
 0x961   : > { %3273 = vadd.xlane.f32.xlu1 %v3272_v36 }
 0x962   : > { %v3275_v5 = vsel %vm623_vm0, %v5815_v20, 0.0 }
 0x963   : > { %3276 = vadd.xlane.f32.xlu0 %v3275_v5 }
 0x967   : > { %3279 = vadd.xlane.f32.xlu0 %v3278_v34 }
 0x9ee   : > { %v3274_v63 = vpop.xlane.xlu1 %3273 }
 0x9ef   : > { %v3281_v39 = vmul.f32 0.03125, %v3274_v63 }
 0x9f0   : > { %v3277_v50 = vpop.xlane.xlu0 %3276 }
 0x9f1   : > { %v3284_v2 = vsub.f32 %v5812_v15, %v3281_v39  ;;  %v3282_v40 = vmul.f32 0.03125, %v3277_v50 }
 0x9f3   : > { %v3285_v41 = vsub.f32 %v5815_v20, %v3282_v40  ;;  %v3287_v25 = vmul.f32 %v3284_v2, %v3284_v2 }
 0x9f4   : > { %v3280_v42 = vpop.xlane.xlu0 %3279 }
 0x9f5   : > { %v3283_v0 = vmul.f32 0.03125, %v3280_v42  ;;  %v3290_v45 = vsel %vm623_vm0, %v3287_v25, 0.0  ;;  %v3288_v46 = vmul.f32 %v3285_v41, %v3285_v41 }
 0x9f6   : > { %3291 = vadd.xlane.f32.xlu0 %v3290_v45 }
 0x9f7   : > { %v3286_v61 = vsub.f32 %v5820_v6, %v3283_v0  ;;  %v3293_v52 = vsel %vm623_vm0, %v3288_v46, 0.0  ;;  %v3814_v46 = vld [vmem:[#allocation22] ss:$0 sm:$0xff] }
 0x9f8   : > { %3294 = vadd.xlane.f32.xlu1 %v3293_v52 }
 0x9f9   : > { %v3289_v62 = vmul.f32 %v3286_v61, %v3286_v61 }
 0x9fb   : > { %v3296_v29 = vsel %vm623_vm0, %v3289_v62, 0.0 }
 0x9fc   : > { %3297 = vadd.xlane.f32.xlu0 %v3296_v29 }
 0xa83   : > { %v3292_v3 = vpop.xlane.xlu0 %3291 }
 0xa84   : > { %v3299_v7 = vmul.f32 0.03125, %v3292_v3 }
 0xa85   : > { %v3295_v53 = vpop.xlane.xlu1 %3294 }
 0xa86   : > { %v3302_v8 = vadd.f32 1e-05, %v3299_v7  ;;  %v3300_v43 = vmul.f32 0.03125, %v3295_v53 }
 0xa88   : > { %4251 = vrsqrt.f32 %v3302_v8  ;;  %v3303_v51 = vadd.f32 1e-05, %v3300_v43 }
 0xa89   : > { %v3298_v1 = vpop.xlane.xlu0 %3297 }
 0xa8a   : > { %4253 = vrsqrt.f32 %v3303_v51  ;;  %v3301_v9 = vmul.f32 0.03125, %v3298_v1 }
 0xa8c   : > { %v3304_v48 = vadd.f32 1e-05, %v3301_v9 }
 0xa8e   : > { %4255 = vrsqrt.f32 %v3304_v48 }
 0xa92   : > { %v4252_v49 = vpop.eup %4251 }
 0xa93   : > { %v3308_v47 = vmul.f32 %v4252_v49, %v3284_v2 }
 0xa94   : > { %v4254_v58 = vpop.eup %4253 }
 0xa95   : > { %v3309_v4 = vmul.f32 %v4254_v58, %v3285_v41  ;;  %v3317_v10 = vmul.f32 %v3807_v11, %v3308_v47 }
 0xa97   : > { %v3318_v54 = vmul.f32 %v3807_v11, %v3309_v4  ;;  %v3326_v57 = vadd.f32 %v3808_v21, %v3317_v10 }
 0xa98   : > { %v4256_v56 = vpop.eup %4255 }
 0xa99   : > { %v3310_v16 = vmul.f32 %v4256_v56, %v3286_v61  ;;  %v3327_v13 = vadd.f32 %v3808_v21, %v3318_v54 }
 0xa9b   : > { %v3319_v17 = vmul.f32 %v3807_v11, %v3310_v16  ;;  %v3329_v27 = vpack.c.bf16 %v3327_v13, %v3326_v57 }
 0xa9d   : > { %3958 = vmatprep.mubr.msk.bf16.mxu0 %vm623_vm0, %v3329_v27  ;;  %v3328_v59 = vadd.f32 %v3808_v21, %v3319_v17 }
 0xa9f   : > { %v3330_v22 = vpack.c.bf16 %v3328_v59, %v3328_v59 }
 0xaa1   : > { %3959 = vmatmul.mubr.msk.bf16.vlgmr.msra.gmra.mrb[20].mxu0 %vm623_vm0, %v3330_v22 }
 0xb74   : > { %v3960_v60 = vpop.f32.mrb[20].mxu0 }
 0xb75   : > { %v3403_v26 = vadd.f32 %v3960_v60, %v3809_v24  ;;  %v3394_v32 = vpop.f32.mrb[21].mxu0 }
 0xb76   : > { %v3395_v33 = vadd.f32 %v3809_v24, %v3394_v32  ;;  %v3961_v28 = vpop.f32.mrb[22].mxu0 }
 0xb77   : > { %v3413_v35 = vmul.f32 0.70710677, %v3403_v26  ;;  %v3397_v38 = vpop.f32.mrb[23].mxu0  ;;  %v3410_v39 = vmul.f32 0.5, %v3403_v26 }
 0xb78   : > { %v3411_v14 = vmul.f32 0.70710677, %v3395_v33  ;;  %v3398_v55 = vadd.f32 %v3809_v24, %v3397_v38  ;;  %v3408_v50 = vmul.f32 0.5, %v3395_v33 }
 0xb79   : > { %4257 = verf.f32 %v3413_v35 }
 0xb7a   : > { %4259 = verf.f32 %v3411_v14  ;;  %v3412_v19 = vmul.f32 0.70710677, %v3398_v55  ;;  %v3409_v2 = vmul.f32 0.5, %v3398_v55 }
 0xb7c   : > { %4261 = verf.f32 %v3412_v19 }
 0xb83   : > { %v4258_v36 = vpop.eup %4257 }
 0xb84   : > { %v4260_v44 = vpop.eup %4259  ;;  %v3419_v5 = vadd.f32 1.0, %v4258_v36 }
 0xb85   : > { %v3417_v34 = vadd.f32 1.0, %v4260_v44 }
 0xb86   : > { %v4262_v63 = vpop.eup %4261  ;;  %v3422_v41 = vmul.f32 %v3419_v5, %v3410_v39 }
 0xb87   : > { %v3418_v40 = vadd.f32 1.0, %v4262_v63  ;;  %v3420_v25 = vmul.f32 %v3417_v34, %v3408_v50 }
 0xb88   : > { %v3424_v45 = vpack.c.bf16 %v3422_v41, %v3422_v41 }
 0xb89   : > { %v3421_v42 = vmul.f32 %v3418_v40, %v3409_v2 }
 0xb8b   : > { %v3423_v0 = vpack.c.bf16 %v3421_v42, %v3420_v25 }
 0xb8d   : > { %3970 = vmatprep.mubr.msk.bf16.mxu1 %vm3464_vm5, %v3423_v0 }
 0xb8e   : > { %3971 = vmatmul.mubr.msk.bf16.vlgmr.msra.gmra.mrb[20].mxu1 %vm3464_vm5, %v3424_v45 }
 0xc61   : > { %v3972_v61 = vpop.f32.mrb[20].mxu1 }
 0xc62   : > { %v3514_v52 = vadd.f32 %v3972_v61, %v3814_v46  ;;  %v3505_v62 = vpop.f32.mrb[21].mxu1 }
 0xc63   : > { %v3506_v29 = vadd.f32 %v3814_v46, %v3505_v62  ;;  %v3973_v37 = vpop.f32.mrb[22].mxu1 }
 0xc64   : > { %v3521_v12 = vadd.f32 %v3514_v52, %v5820_v6  ;;  %v3508_v3 = vpop.f32.mrb[23].mxu1 }
 0xc65   : > { %v3519_v7 = vadd.f32 %v3506_v29, %v5812_v15  ;;  %v3509_v53 = vadd.f32 %v3814_v46, %v3508_v3 }
 0xc66   : > { %3524 = vst.msk [vmem:[%s616_s17 + $0x10] sm:$0xff] %vm623_vm0, %v3521_v12 }
 0xc67   : > { %3522 = vst.msk [vmem:[%s616_s17] sm:$0xff] %vm623_vm0, %v3519_v7  ;;  %v3520_v8 = vadd.f32 %v3509_v53, %v5815_v20 }
 0xc69   : > { %3523 = vst.msk [vmem:[%s616_s17 + $0x8] sm:$0xff] %vm623_vm0, %v3520_v8 }
 0xc6a   : > { %4645 = shalt.err (!%p4642_p7)
}
 0xc6b   : > { %s4646_s17 = scalar_lea.hbm %s5847_s16, 384  ;;  %s4650_s22 = scalar_lea.hbm %s5956_s24, 768 }
 0xc6c   : > { %p4647_p5 = scmp.ne.s32.totalorder %s5847_s16, %s4646_s17  ;;  %p4651_p13 = scmp.lt.u32.totalorder %s5847_s16, %s5956_s24 }
 0xc6d   : > { %p4652_p1 = scmp.lt.u32.totalorder %s4650_s22, %s4646_s17  ;;  %p4654_p2 = scmp.lt.u32.totalorder %s4646_s17, %s5847_s16 }
 0xc6e   : > { %p4648_p9 = pnand %p4647_p5, %p5957_p8 }
 0xc6f   : > { %p4653_p3 = por %p4652_p1, %p4651_p13 }
 0xc70   : > { %p4649_p12 = pneg %p4648_p9 }
 0xc71   : > { %p4655_p4 = por %p4654_p2, %p4653_p3 }
 0xc73   : > { %p4656_p10 = pnand %p4655_p4, %p4649_p12 }
 0xc75   : > { %4659 = shalt.err (!%p4656_p10)
}
 0xc76   : > { %s4752_s1 = smov 128  }
 0xc77   : > { %4040 = dma.vmem_to_hbm [thread:$0]  (%p5957_p8), %s5840_s25, 384, %s5847_s16, %s3526_s23, %s4752_s1, %s4752_s1, %s4749_s3  }
 0xc78 PF: > { %s5958_s19 = sld [smem:[#allocation32_spill]]  ;;  %p5959_p11 = scmp.ne.s32.totalorder %s5938_s29, 0 }
 0xc79   : > { %p5960_p0 = scmp.ge.s32.totalorder %s4722_s28, 2 }
 0xc7b   : > { %p4084_p6 = pnand %p5960_p0, %p5959_p11 }
 0xc7e   : > { %s3554_s21 = sand.u32 1, %s5958_s19  }
 0xc7f   : > { %s3555_s17 = scalar_lea.sflag [#allocation4], %s3554_s21 }
 0xc80   : > { %4705 = dma.done.wait (!%p4084_p6), %s3555_s17, 384  }
 0xc81   : > { %4707 = vsyncadd (!%p4084_p6), %s3555_s17, 4294966912  ;;  %p32_p7 = scmp.ge.s32.totalorder %s5120_s18, 4   ;;  %s5961_s25 = smov %s4714_s26 }
 0xc82   : > { %s5962_s26 = smov %s4718_s27  ;;  %s5963_s27 = smov %s5131_s13 }
 0xc83   : > { %s5964_s28 = smov %s5120_s18  ;;  %34 = sbr.rel (!%p32_p7) target bundleno = 17 (0x11), region = 165 }
 0xc8a   :  { %3560 = vsyncpa [#allocation3], 1 }
 0xc8b   :  { %3562 = vsyncpa [#allocation3 + $0x1], 1 }
 0xc8c   :  { %3563 = vsyncpa [#allocation6], 1 }
 0xc8d   :  { %3564 = vsyncpa [#allocation9], 1 }
 0xc8e   :  { %3565 = vsyncpa [#allocation12], 1 }
 0xc8f   :  { %3566 = vsyncpa [#allocation15], 1 }
 0xc90   :  { %3567 = vsyncpa [#allocation18], 1 }
 0xc91   :  { %3568 = vsyncpa [#allocation21], 1 }
 0xc92   :  { %3569 = vsyncpa [#allocation4], 1 }
 0xc93   :  { %3571 = vsyncpa [#allocation4 + $0x1], 1 }

</bundles_post_ra>
